<compile_context>
chip_gen: v6e
topology: v6e:2x2x1
jax: 0.10.0
libtpu: 0.0.40
codegen_flags: <defaults>
</compile_context>

<pallas_src>
import functools

import jax
import jax.numpy as jnp
from jax.experimental import pallas as pl
from jax.experimental.pallas import tpu as pltpu


def _mha_kernel(q_ref, k_ref, v_ref, wq_ref, wk_ref, wv_ref, wp_ref, bp_ref,
                out_ref, *, num_heads: int):
    """One batch element per grid step.

    q_ref/k_ref/v_ref   : (1, N, C)  bf16 activations
    wq_ref/wk_ref/wv_ref: (C, C)     bf16 projection weights (scale folded into wq)
    wp_ref              : (C, Cp)    bf16 output projection (lane-padded iff C % 128 != 0)
    bp_ref              : (1, Cp)    f32  output bias
    out_ref             : (1, N, Cp) f32
    """
    q = q_ref[0]                                   # (N, C) bf16
    k = k_ref[0]
    v = v_ref[0]
    n, c = q.shape
    h = num_heads
    d = c // h

    # --- QKV projections: three full C-wide MXU matmuls, f32 accumulation. ---
    qp = jnp.dot(q, wq_ref[...], preferred_element_type=jnp.float32)    # (N, C)
    kp = jnp.dot(k, wk_ref[...], preferred_element_type=jnp.float32)    # (N, C)
    vp = jnp.dot(v, wv_ref[...], preferred_element_type=jnp.float32)    # (N, C)

    # View the last dim as (H, D) (torch weight columns are already head-major) and go
    # head-major once for the batched attention matmuls.
    qh = jnp.transpose(qp.reshape(n, h, d), (1, 0, 2)).astype(jnp.bfloat16)  # (H, N, D)
    kh = jnp.transpose(kp.reshape(n, h, d), (1, 0, 2)).astype(jnp.bfloat16)  # (H, N, D)
    vh = jnp.transpose(vp.reshape(n, h, d), (1, 0, 2)).astype(jnp.bfloat16)  # (H, N, D)

    # --- Scaled dot-product attention, all heads batched (scale pre-folded into wq). ---
    logits = jnp.einsum('hqd,hkd->hqk', qh, kh,
                        preferred_element_type=jnp.float32)             # (H, N, N) f32
    m = jnp.max(logits, axis=-1, keepdims=True)
    e = jnp.exp(logits - m)
    s = jnp.sum(e, axis=-1, keepdims=True)
    p = e * pl.reciprocal(s, approx=True)                               # softmax (EUP recip)

    o = jnp.einsum('hqk,hkd->hqd', p.astype(jnp.bfloat16), vh,
                   preferred_element_type=jnp.float32)                  # (H, N, D) f32

    # --- Head concat folded into the output projection: one C-deep matmul + bias. ---
    o = jnp.transpose(o, (1, 0, 2)).reshape(n, c).astype(jnp.bfloat16)  # (N, C)
    out = jnp.dot(o, wp_ref[...], preferred_element_type=jnp.float32) + bp_ref[...]
    out_ref[0] = out.astype(out_ref.dtype)                              # (N, Cp) lane-dense


def multi_head_attention(k, q, v, w_q, w_k, w_v, w_proj, b_proj, *, num_heads: int):
    """Pallas implementation of MultiHeadAttentionLayer.forward (mha_output only).

    Args:
      k, q, v : (B, N, C) float32
      w_q/k/v : (C, C) projection weights (x @ W convention)
      w_proj  : (C, C) output projection weight
      b_proj  : (C,)   output projection bias
    Returns:
      mha_output: (B, N, C) float32
    """
    B, N, C = v.shape
    assert C % num_heads == 0
    H = num_heads
    D = C // H
    scale = D ** (-0.5)

    # Lane-pad the output projection only when C is not already a multiple of 128.
    pad = (-C) % 128
    Cp = C + pad

    # Weights: scale folded into wq (f32) before the bf16 cast.
    wq = (w_q * scale).astype(jnp.bfloat16)                              # (C, C)
    wk = w_k.astype(jnp.bfloat16)
    wv = w_v.astype(jnp.bfloat16)
    wp = (jnp.pad(w_proj, ((0, 0), (0, pad))) if pad else w_proj).astype(jnp.bfloat16)  # (C, Cp)
    bp = (jnp.pad(b_proj, (0, pad)) if pad else b_proj).reshape(1, Cp).astype(jnp.float32)

    qb = q.astype(jnp.bfloat16)
    kb = k.astype(jnp.bfloat16)
    vb = v.astype(jnp.bfloat16)

    # Advisory cost estimate for XLA scheduling around the custom call.
    flops = int(B * (3 * 2 * N * C * C          # qkv projections
                     + 2 * 2 * H * N * N * D    # logits + P@V
                     + 2 * N * C * Cp))         # output projection
    transcendentals = int(B * (H * N * N + H * N))
    bytes_accessed = int(3 * B * N * C * 2 + (3 * C * C + C * Cp) * 2 + Cp * 4
                         + B * N * Cp * 4)

    kernel = functools.partial(_mha_kernel, num_heads=H)

    out_padded = pl.pallas_call(
        kernel,
        out_shape=jax.ShapeDtypeStruct((B, N, Cp), q.dtype),
        grid_spec=pltpu.PrefetchScalarGridSpec(
            num_scalar_prefetch=0,
            grid=(B,),
            in_specs=[
                pl.BlockSpec((1, N, C), lambda b: (b, 0, 0)),   # q
                pl.BlockSpec((1, N, C), lambda b: (b, 0, 0)),   # k
                pl.BlockSpec((1, N, C), lambda b: (b, 0, 0)),   # v
                pl.BlockSpec((C, C), lambda b: (0, 0)),         # wq (scaled)
                pl.BlockSpec((C, C), lambda b: (0, 0)),         # wk
                pl.BlockSpec((C, C), lambda b: (0, 0)),         # wv
                pl.BlockSpec((C, Cp), lambda b: (0, 0)),        # w_proj
                pl.BlockSpec((1, Cp), lambda b: (0, 0)),        # b_proj
            ],
            out_specs=pl.BlockSpec((1, N, Cp), lambda b: (b, 0, 0)),
        ),
        compiler_params=pltpu.CompilerParams(
            dimension_semantics=("parallel",)),
        cost_estimate=pl.CostEstimate(flops=flops,
                                      transcendentals=transcendentals,
                                      bytes_accessed=bytes_accessed),
    )(qb, kb, vb, wq, wk, wv, wp, bp)

    return out_padded[..., :C] if pad else out_padded


def _reference(k, q, v, w_q, w_k, w_v, w_proj, b_proj, *, num_heads: int):
    """Pure-JAX f32 reference mirroring the PyTorch module semantics."""
    B, N, C = v.shape
    D = C // num_heads
    scale = D ** (-0.5)

    def split_heads(x):  # (B, N, C) -> (B, H, N, D)
        return x.reshape(B, N, num_heads, D).transpose(0, 2, 1, 3)

    wq = split_heads(q @ w_q)
    wk = split_heads(k @ w_k)
    wv = split_heads(v @ w_v)
    attn = jnp.einsum('bhnd,bhmd->bhnm', wq, wk) * scale
    attn = jax.nn.softmax(attn, axis=-1)
    o = jnp.einsum('bhnm,bhmd->bhnd', attn, wv)
    o = o.transpose(0, 2, 1, 3).reshape(B, N, C)
    return o @ w_proj + b_proj


if __name__ == "__main__":
    B, N, C = 2, 8, 32
    num_heads = 8

    key = jax.random.PRNGKey(0)
    keys = jax.random.split(key, 8)

    # Inputs (k, q, v) — the layer accepts arbitrary (q, k, v) tuples.
    k_in = jax.random.normal(keys[0], (B, N, C), dtype=jnp.float32)
    q_in = jax.random.normal(keys[1], (B, N, C), dtype=jnp.float32)
    v_in = jax.random.normal(keys[2], (B, N, C), dtype=jnp.float32)

    # Deterministic parameter init (synthetic, not a checkpoint load).
    w_q = 0.05 * jax.random.normal(keys[3], (C, C), dtype=jnp.float32)
    w_k = 0.05 * jax.random.normal(keys[4], (C, C), dtype=jnp.float32)
    w_v = 0.05 * jax.random.normal(keys[5], (C, C), dtype=jnp.float32)
    w_p = 0.05 * jax.random.normal(keys[6], (C, C), dtype=jnp.float32)
    b_p = 0.05 * jax.random.normal(keys[7], (C,), dtype=jnp.float32)

    out = multi_head_attention(k_in, q_in, v_in, w_q, w_k, w_v, w_p, b_p,
                               num_heads=num_heads)
    out = jax.block_until_ready(out)

    ref = _reference(k_in, q_in, v_in, w_q, w_k, w_v, w_p, b_p,
                     num_heads=num_heads)
    assert out.shape == (B, N, C)
    # Tolerance loosened for bf16 matmul inputs (f32 accumulation, f32 softmax).
    assert jnp.allclose(out, ref, atol=2e-2, rtol=2e-2), "mismatch vs reference"

    print("KERNEL_OK")
</pallas_src>

<mosaic_0001>
module attributes {stable_mosaic.version = 11 : i64} {
  func.func @_mha_kernel(%arg0: i32, %arg1: memref<1x8x32xbf16, #tpu.memory_space<vmem>>, %arg2: memref<1x8x32xbf16, #tpu.memory_space<vmem>>, %arg3: memref<1x8x32xbf16, #tpu.memory_space<vmem>>, %arg4: memref<32x32xbf16, #tpu.memory_space<vmem>>, %arg5: memref<32x32xbf16, #tpu.memory_space<vmem>>, %arg6: memref<32x32xbf16, #tpu.memory_space<vmem>>, %arg7: memref<32x128xbf16, #tpu.memory_space<vmem>>, %arg8: memref<1x128xf32, #tpu.memory_space<vmem>>, %arg9: memref<1x8x128xf32, #tpu.memory_space<vmem>>) attributes {dimension_semantics = [#tpu.dimension_semantics<parallel>], iteration_bounds = array<i64: 2>, scalar_prefetch = 0 : i64, scratch_operands = 0 : i64, tpu.core_type = #tpu.core_type<tc>, window_params = [{transform_indices = @transform_0, window_bounds = array<i64: 1, 8, 32>}, {transform_indices = @transform_1, window_bounds = array<i64: 1, 8, 32>}, {transform_indices = @transform_2, window_bounds = array<i64: 1, 8, 32>}, {pipeline_mode = #tpu.pipeline_mode<synchronous>, transform_indices = @transform_3, window_bounds = array<i64: 32, 32>}, {pipeline_mode = #tpu.pipeline_mode<synchronous>, transform_indices = @transform_4, window_bounds = array<i64: 32, 32>}, {pipeline_mode = #tpu.pipeline_mode<synchronous>, transform_indices = @transform_5, window_bounds = array<i64: 32, 32>}, {pipeline_mode = #tpu.pipeline_mode<synchronous>, transform_indices = @transform_6, window_bounds = array<i64: 32, 128>}, {pipeline_mode = #tpu.pipeline_mode<synchronous>, transform_indices = @transform_7, window_bounds = array<i64: 1, 128>}, {transform_indices = @transform_8, window_bounds = array<i64: 1, 8, 128>}]} {
    %c0 = arith.constant 0 : index
    %c0_0 = arith.constant 0 : index
    %c0_1 = arith.constant 0 : index
    %0 = vector.load %arg1[%c0, %c0_0, %c0_1] : memref<1x8x32xbf16, #tpu.memory_space<vmem>>, vector<1x8x32xbf16>
    %1 = vector.shape_cast %0 : vector<1x8x32xbf16> to vector<8x32xbf16>
    %c0_2 = arith.constant 0 : index
    %c0_3 = arith.constant 0 : index
    %c0_4 = arith.constant 0 : index
    %2 = vector.load %arg2[%c0_2, %c0_3, %c0_4] : memref<1x8x32xbf16, #tpu.memory_space<vmem>>, vector<1x8x32xbf16>
    %3 = vector.shape_cast %2 : vector<1x8x32xbf16> to vector<8x32xbf16>
    %c0_5 = arith.constant 0 : index
    %c0_6 = arith.constant 0 : index
    %c0_7 = arith.constant 0 : index
    %4 = vector.load %arg3[%c0_5, %c0_6, %c0_7] : memref<1x8x32xbf16, #tpu.memory_space<vmem>>, vector<1x8x32xbf16>
    %5 = vector.shape_cast %4 : vector<1x8x32xbf16> to vector<8x32xbf16>
    %c0_8 = arith.constant 0 : index
    %c0_9 = arith.constant 0 : index
    %6 = vector.load %arg4[%c0_8, %c0_9] : memref<32x32xbf16, #tpu.memory_space<vmem>>, vector<32x32xbf16>
    %cst = arith.constant dense<0.000000e+00> : vector<8x32xf32>
    %7 = tpu.matmul %1, %6, %cst {dimension_numbers = #tpu.dot_dimension_numbers<[1], [0], [0], [1], [0, 0, 1, 1], [], []>} : vector<8x32xbf16>, vector<32x32xbf16>, vector<8x32xf32> -> vector<8x32xf32>
    %c0_10 = arith.constant 0 : index
    %c0_11 = arith.constant 0 : index
    %8 = vector.load %arg5[%c0_10, %c0_11] : memref<32x32xbf16, #tpu.memory_space<vmem>>, vector<32x32xbf16>
    %cst_12 = arith.constant dense<0.000000e+00> : vector<8x32xf32>
    %9 = tpu.matmul %3, %8, %cst_12 {dimension_numbers = #tpu.dot_dimension_numbers<[1], [0], [0], [1], [0, 0, 1, 1], [], []>} : vector<8x32xbf16>, vector<32x32xbf16>, vector<8x32xf32> -> vector<8x32xf32>
    %c0_13 = arith.constant 0 : index
    %c0_14 = arith.constant 0 : index
    %10 = vector.load %arg6[%c0_13, %c0_14] : memref<32x32xbf16, #tpu.memory_space<vmem>>, vector<32x32xbf16>
    %cst_15 = arith.constant dense<0.000000e+00> : vector<8x32xf32>
    %11 = tpu.matmul %5, %10, %cst_15 {dimension_numbers = #tpu.dot_dimension_numbers<[1], [0], [0], [1], [0, 0, 1, 1], [], []>} : vector<8x32xbf16>, vector<32x32xbf16>, vector<8x32xf32> -> vector<8x32xf32>
    %12 = vector.shape_cast %7 : vector<8x32xf32> to vector<8x8x4xf32>
    %13 = tpu.transpose %12, [1, 0, 2] : vector<8x8x4xf32> -> vector<8x8x4xf32>
    %14 = arith.truncf %13 : vector<8x8x4xf32> to vector<8x8x4xbf16>
    %15 = vector.shape_cast %9 : vector<8x32xf32> to vector<8x8x4xf32>
    %16 = tpu.transpose %15, [1, 0, 2] : vector<8x8x4xf32> -> vector<8x8x4xf32>
    %17 = arith.truncf %16 : vector<8x8x4xf32> to vector<8x8x4xbf16>
    %18 = vector.shape_cast %11 : vector<8x32xf32> to vector<8x8x4xf32>
    %19 = tpu.transpose %18, [1, 0, 2] : vector<8x8x4xf32> -> vector<8x8x4xf32>
    %20 = arith.truncf %19 : vector<8x8x4xf32> to vector<8x8x4xbf16>
    "tpu.trace_start"() <{level = 10 : i32, message = "hqd,hkd->hqk"}> : () -> ()
    %cst_16 = arith.constant dense<0.000000e+00> : vector<8x8x8xf32>
    %21 = tpu.matmul %14, %17, %cst_16 {dimension_numbers = #tpu.dot_dimension_numbers<[2], [2], [1], [1], [0, 0, 0, 1, 1, 1], [0], [0]>} : vector<8x8x4xbf16>, vector<8x8x4xbf16>, vector<8x8x8xf32> -> vector<8x8x8xf32>
    "tpu.trace_stop"() : () -> ()
    %cst_17 = arith.constant dense<0xFF800000> : vector<8x8xf32>
    %22 = vector.multi_reduction <maximumf>, %21, %cst_17 [2] : vector<8x8x8xf32> to vector<8x8xf32>
    %23 = vector.shape_cast %22 : vector<8x8xf32> to vector<8x8x1xf32>
    %24 = vector.broadcast %23 : vector<8x8x1xf32> to vector<8x8x8xf32>
    %25 = arith.subf %21, %24 : vector<8x8x8xf32>
    %26 = math.exp %25 : vector<8x8x8xf32>
    %cst_18 = arith.constant dense<0.000000e+00> : vector<8x8xf32>
    %27 = vector.multi_reduction <add>, %26, %cst_18 [2] : vector<8x8x8xf32> to vector<8x8xf32>
    %28 = vector.shape_cast %27 : vector<8x8xf32> to vector<8x8x1xf32>
    %29 = tpu.reciprocal %28 {approx = true} : vector<8x8x1xf32> -> vector<8x8x1xf32>
    %30 = vector.broadcast %29 : vector<8x8x1xf32> to vector<8x8x8xf32>
    %31 = arith.mulf %26, %30 : vector<8x8x8xf32>
    %32 = arith.truncf %31 : vector<8x8x8xf32> to vector<8x8x8xbf16>
    "tpu.trace_start"() <{level = 10 : i32, message = "hqk,hkd->hqd"}> : () -> ()
    %cst_19 = arith.constant dense<0.000000e+00> : vector<8x8x4xf32>
    %33 = tpu.matmul %32, %20, %cst_19 {dimension_numbers = #tpu.dot_dimension_numbers<[2], [1], [1], [2], [0, 0, 0, 1, 1, 2], [0], [0]>} : vector<8x8x8xbf16>, vector<8x8x4xbf16>, vector<8x8x4xf32> -> vector<8x8x4xf32>
    "tpu.trace_stop"() : () -> ()
    %34 = tpu.transpose %33, [1, 0, 2] : vector<8x8x4xf32> -> vector<8x8x4xf32>
    %35 = vector.shape_cast %34 : vector<8x8x4xf32> to vector<8x32xf32>
    %36 = arith.truncf %35 : vector<8x32xf32> to vector<8x32xbf16>
    %c0_20 = arith.constant 0 : index
    %c0_21 = arith.constant 0 : index
    %37 = vector.load %arg7[%c0_20, %c0_21] : memref<32x128xbf16, #tpu.memory_space<vmem>>, vector<32x128xbf16>
    %cst_22 = arith.constant dense<0.000000e+00> : vector<8x128xf32>
    %38 = tpu.matmul %36, %37, %cst_22 {dimension_numbers = #tpu.dot_dimension_numbers<[1], [0], [0], [1], [0, 0, 1, 1], [], []>} : vector<8x32xbf16>, vector<32x128xbf16>, vector<8x128xf32> -> vector<8x128xf32>
    %c0_23 = arith.constant 0 : index
    %c0_24 = arith.constant 0 : index
    %39 = vector.load %arg8[%c0_23, %c0_24] : memref<1x128xf32, #tpu.memory_space<vmem>>, vector<1x128xf32>
    %40 = vector.broadcast %39 : vector<1x128xf32> to vector<8x128xf32>
    %41 = arith.addf %38, %40 : vector<8x128xf32>
    %c0_25 = arith.constant 0 : index
    %c0_26 = arith.constant 0 : index
    %c0_27 = arith.constant 0 : index
    %42 = vector.load %arg9[%c0_25, %c0_26, %c0_27] : memref<1x8x128xf32, #tpu.memory_space<vmem>>, vector<1x8x128xf32>
    %43 = vector.shape_cast %42 : vector<1x8x128xf32> to vector<8x128xf32>
    %44 = vector.shape_cast %41 : vector<8x128xf32> to vector<1x8x128xf32>
    tpu.vector_store %arg9[%c0_25, %c0_26, %c0_27], %44 {strides = array<i32>} : memref<1x8x128xf32, #tpu.memory_space<vmem>>, vector<1x8x128xf32>,
    return
  }
  func.func @transform_0(%arg0: i32) -> (i32, i32, i32) {
    %c0_i32 = arith.constant 0 : i32
    %c0_i32_0 = arith.constant 0 : i32
    %c0_i32_1 = arith.constant 0 : i32
    return %arg0, %c0_i32, %c0_i32_0 : i32, i32, i32
  }
  func.func @transform_1(%arg0: i32) -> (i32, i32, i32) {
    %c0_i32 = arith.constant 0 : i32
    %c0_i32_0 = arith.constant 0 : i32
    %c0_i32_1 = arith.constant 0 : i32
    return %arg0, %c0_i32, %c0_i32_0 : i32, i32, i32
  }
  func.func @transform_2(%arg0: i32) -> (i32, i32, i32) {
    %c0_i32 = arith.constant 0 : i32
    %c0_i32_0 = arith.constant 0 : i32
    %c0_i32_1 = arith.constant 0 : i32
    return %arg0, %c0_i32, %c0_i32_0 : i32, i32, i32
  }
  func.func @transform_3(%arg0: i32) -> (i32, i32) {
    %c0_i32 = arith.constant 0 : i32
    %c0_i32_0 = arith.constant 0 : i32
    %c0_i32_1 = arith.constant 0 : i32
    return %c0_i32, %c0_i32_0 : i32, i32
  }
  func.func @transform_4(%arg0: i32) -> (i32, i32) {
    %c0_i32 = arith.constant 0 : i32
    %c0_i32_0 = arith.constant 0 : i32
    %c0_i32_1 = arith.constant 0 : i32
    return %c0_i32, %c0_i32_0 : i32, i32
  }
  func.func @transform_5(%arg0: i32) -> (i32, i32) {
    %c0_i32 = arith.constant 0 : i32
    %c0_i32_0 = arith.constant 0 : i32
    %c0_i32_1 = arith.constant 0 : i32
    return %c0_i32, %c0_i32_0 : i32, i32
  }
  func.func @transform_6(%arg0: i32) -> (i32, i32) {
    %c0_i32 = arith.constant 0 : i32
    %c0_i32_0 = arith.constant 0 : i32
    %c0_i32_1 = arith.constant 0 : i32
    return %c0_i32, %c0_i32_0 : i32, i32
  }
  func.func @transform_7(%arg0: i32) -> (i32, i32) {
    %c0_i32 = arith.constant 0 : i32
    %c0_i32_0 = arith.constant 0 : i32
    %c0_i32_1 = arith.constant 0 : i32
    return %c0_i32, %c0_i32_0 : i32, i32
  }
  func.func @transform_8(%arg0: i32) -> (i32, i32, i32) {
    %c0_i32 = arith.constant 0 : i32
    %c0_i32_0 = arith.constant 0 : i32
    %c0_i32_1 = arith.constant 0 : i32
    return %arg0, %c0_i32, %c0_i32_0 : i32, i32, i32
  }
}

</mosaic_0001>

<bundles_post_ra>
// kernel: tpu_custom_call.1
= control target key start
LH: loop header
LB: loop body
LE: loop exit
PB: predicated region body
PF: predicated region fallthrough
CT: control target
= control target key end

     0   :  { %s4331_s0 = inlined_call_operand.hbm [shape: bf16[2,8,32], index: 0, kind: input, shape index: {}]   ;;  %s4332_s1 = inlined_call_operand.hbm [shape: bf16[2,8,32], index: 1, kind: input, shape index: {}]   ;;  %s4333_s2 = inlined_call_operand.hbm [shape: bf16[2,8,32], index: 2, kind: input, shape index: {}]   ;;  %s4334_s3 = inlined_call_operand.hbm [shape: bf16[32,32], index: 3, kind: input, shape index: {}]   ;;  %s4335_s4 = inlined_call_operand.hbm [shape: bf16[32,32], index: 4, kind: input, shape index: {}]   ;;  %s4336_s5 = inlined_call_operand.hbm [shape: bf16[32,32], index: 5, kind: input, shape index: {}]   ;;  %s4337_s6 = inlined_call_operand.hbm [shape: bf16[32,128], index: 6, kind: input, shape index: {}]   ;;  %s4338_s7 = inlined_call_operand.vmem [shape: f32[1,128], index: 7, kind: input, shape index: {}]   ;;  %s4339_s8 = inlined_call_operand.hbm [shape: f32[2,8,128], index: 8, kind: output, shape index: {}]  }
   0x1   :  { %4358 = sst [smem:[#allocation24_spill]] %s4331_s0 }
   0x2   :  { %4359 = sst [smem:[#allocation25_spill]] %s4332_s1 }
   0x3   :  { %4360 = sst [smem:[#allocation26_spill]] %s4334_s3 }
   0x4   :  { %4361 = sst [smem:[#allocation27_spill]] %s4336_s5 }
   0x5   :  { %13 = vsyncpa [#allocation3], 0 }
   0x6   :  { %15 = vsyncpa [#allocation3 + $0x1], 0 }
   0x7   :  { %16 = vsyncpa [#allocation6], 0 }
   0x8   :  { %18 = vsyncpa [#allocation6 + $0x1], 0 }
   0x9   :  { %19 = vsyncpa [#allocation9], 0 }
   0xa   :  { %20 = vsyncpa [#allocation12], 0 }
   0xb   :  { %21 = vsyncpa [#allocation4], 0 }
   0xc   :  { %23 = vsyncpa [#allocation4 + $0x1], 0  ;;  %s3673_s27 = smov 0   ;;  %s3675_s28 = smov 0  }
   0xd   :  { %s3677_s29 = smov 0   ;;  %s3679_s30 = smov 0  }
   0xe LB: > { %4362 = sst [smem:[#allocation20_spill]] %s3598_s30  ;;  %s3600_s9 = smov [#allocation8]   ;;  %s3598_s30 = sphi %s3679_s30, %s4395_s30   ;;  %s3594_s29 = sphi %s3677_s29, %s4399_s29   ;;  %s3590_s28 = sphi %s3675_s28, %s4398_s28   ;;  %s3586_s27 = sphi %s3673_s27, %s4397_s27  }
   0xf   : > { %s255_s10 = sshll.u32 %s3600_s9, 4  ;;  %s3694_s11 = sadd.s32 4294967295, %s3598_s30   ;;  %s256_s10 = int_to_ptr.vmem [resolvable:$true] %s255_s10 }
  0x10   : > { %p2919_p0 = scmp.ge.s32.totalorder %s3598_s30, 1  ;;  %p4350_p1 = scmp.eq.s32.totalorder %s3694_s11, 0 }
  0x11   : > { %p243_p2 = scmp.lt.s32.totalorder %s3598_s30, 3  ;;  %s3601_s13 = smov [#allocation11]  }
  0x12   : > { %s281_s14 = sshll.u32 %s3601_s13, 4  ;;  %s3345_s16 = scalar_lea.vmem %s256_s10, 256  ;;  %s282_s14 = int_to_ptr.vmem [resolvable:$true] %s281_s14 }
  0x13   : > { %p3699_p3 = pnand %p2919_p0, %p243_p2  ;;  %p3346_p8 = scmp.ne.s32.totalorder %s256_s10, %s3345_s16 }
  0x14   : > { %p3353_p11 = scmp.lt.s32.totalorder %s256_s10, %s256_s10  ;;  %p3354_p12 = scmp.lt.s32.totalorder %s3345_s16, %s3345_s16 }
  0x15   : > { %s4363_s12 = scalar_select %p3699_p3, 1, 0 }
  0x16   : > { %p3201_p5 = pneg %p3699_p3  ;;  %p3355_p13 = por %p3354_p12, %p3353_p11 }
  0x18   : > { %p3708_p6 = pnand %p3201_p5, %p4350_p1 }
  0x1a   : > { %s4364_s15 = scalar_select %p3708_p6, 1, 0 }
  0x1b   : > { %p4340_p7 = pneg %p3708_p6 }
  0x1d   : > { %p3348_p9 = pnand %p3346_p8, %p4340_p7 }
  0x1f   : > { %p3349_p10 = pneg %p3348_p9 }
  0x21   : > { %p3356_p0 = pnand %p3355_p13, %p3349_p10 }
  0x23   : > { %3359 = shalt.err (!%p3356_p0)
}
  0x24   : > { %s4342_s17 = smov 64   ;;  %s4344_s18 = smov 4  }
  0x25   : > { %s4365_s3 = sld [smem:[#allocation26_spill]]  ;;  %s3371_s21 = scalar_lea.vmem %s282_s14, 256 }
  0x26   : > { %p3372_p2 = scmp.ne.s32.totalorder %s282_s14, %s3371_s21  ;;  %p3379_p9 = scmp.lt.s32.totalorder %s282_s14, %s282_s14 }
  0x27   : > { %p3380_p10 = scmp.lt.s32.totalorder %s3371_s21, %s3371_s21 }
  0x28   : > { %p3374_p5 = pnand %p3372_p2, %p4340_p7 }
  0x29   : > { %p3381_p11 = por %p3380_p10, %p3379_p9 }
  0x2a   : > { %p3375_p8 = pneg %p3374_p5 }
  0x2b   : > { %3204 = dma.hbm_to_vmem [thread:$0]  (!%p3708_p6), %s4365_s3, 256, %s256_s10, [#allocation9], %s4342_s17, %s4342_s17, %s4344_s18  }
  0x2c   : > { %p3382_p12 = pnand %p3381_p11, %p3375_p8 }
  0x2e   : > { %3385 = shalt.err (!%p3382_p12)
}
  0x2f   : > { %s4366_s5 = sld [smem:[#allocation27_spill]]  ;;  %s2918_s24 = sadd.s32 4294967294, %s3598_s30  }
  0x30   : > { %s3738_s25 = sadd.s32 1, %s3598_s30   ;;  %s36_s9 = sadd.s32 1, %s3594_s29 }
  0x31   : > { %4367 = sst [smem:[#allocation21_spill]] %s3738_s25  ;;  %s33_s26 = ssub.s32 %s3598_s30, %s3738_s25 }
  0x32   : > { %p34_p13 = scmp.eq.s32.totalorder %s33_s26, 0  ;;  %p43_p0 = scmp.ne.s32.totalorder %s3594_s29, %s3590_s28 }
  0x33   : > { %p44_p2 = scmp.eq.s32.totalorder %s3598_s30, 0  ;;  %p49_p5 = scmp.ne.s32.totalorder %s3590_s28, %s3586_s27 }
  0x34   : > { %s3749_s10 = scalar_select %p34_p13, %s3594_s29, %s36_s9  }
  0x35   : > { %3210 = dma.hbm_to_vmem [thread:$0]  (!%p3708_p6), %s4366_s5, 256, %s282_s14, [#allocation12], %s4342_s17, %s4342_s17, %s4344_s18  }
  0x36   : > { %4368 = sst [smem:[#allocation22_spill]] %s3749_s10  ;;  %p45_p8 = por %p44_p2, %p43_p0 }
  0x37   : > { %p3753_p9 = por %p4350_p1, %p49_p5  ;;  %p230_p10 = scmp.eq.s32.totalorder %s3694_s11, 1 }
  0x38   : > { %p236_p11 = scmp.eq.s32.totalorder %s2918_s24, 1  ;;  %p3232_p12 = scmp.lt.s32.totalorder %s3598_s30, 2 }
  0x39   : > { %s4369_s13 = scalar_select %p3753_p9, 1, 0 }
  0x3a   : > { %s4341_s14 = sand.u32 1, %s3594_s29   ;;  %p3760_p4 = por %p230_p10, %p43_p0 }
  0x3b   : > { %p3764_p7 = por %p236_p11, %p49_p5  ;;  %s3770_s20 = sshll.u32 %s4341_s14, 2 }
  0x3c   : > { %s4370_s16 = scalar_select %p3760_p4, 1, 0 }
  0x3d   : > { %s4371_s19 = scalar_select %p3764_p7, 1, 0 }
  0x3e   : > { %s3773_s21 = sshll.u32 %s3598_s30, 6  ;;  %p3775_p13 = pnand %p3232_p12, %p45_p8 }
  0x3f   : > { %4372 = sst [smem:[#allocation23_spill]] %s4371_s19  ;;  %s329_s23 = sand.u32 1, %s3598_s30  }
  0x40   : > { %s4374_s1 = sld [smem:[#allocation25_spill]]  ;;  %s333_s14 = scalar_lea.vmem [#allocation5], %s3770_s20 }
  0x41   : > { %s340_s17 = sshll.u32 %s333_s14, 4  ;;  %s3604_s18 = smov [#allocation10]   ;;  %s3787_s17 = int_to_ptr.vmem [resolvable:$true] %s340_s17 }
  0x42   : > { %s268_s3 = sshll.u32 %s3604_s18, 4  ;;  %s3789_s5 = scalar_lea.sflag [#allocation6], %s329_s23  ;;  %s269_s3 = int_to_ptr.vmem [resolvable:$true] %s268_s3 }
  0x43   : > { %p3795_p2 = pneg %p3775_p13 }
  0x45   : > { %s4375_s25 = scalar_select %p3795_p2, 1, 0 }
  0x46   : > { %s3784_s9 = scalar_lea.hbm %s4374_s1, %s3773_s21  ;;  %s3391_s14 = scalar_lea.hbm %s4374_s1, 128 }
  0x47   : > { %s3386_s10 = scalar_lea.hbm %s3784_s9, 64  ;;  %p3392_p10 = scmp.lt.s32.totalorder %s3784_s9, %s4374_s1 }
  0x48   : > { %p3387_p0 = scmp.ne.s32.totalorder %s3784_s9, %s3386_s10  ;;  %p3393_p11 = scmp.lt.s32.totalorder %s3391_s14, %s3386_s10 }
  0x4a   : > { %p3389_p5 = pnand %p3795_p2, %p3387_p0  ;;  %p3394_p12 = por %p3393_p11, %p3392_p10 }
  0x4c   : > { %p3390_p8 = pneg %p3389_p5 }
  0x4e   : > { %p3395_p1 = pnand %p3394_p12, %p3390_p8 }
  0x50   : > { %3398 = shalt.err (!%p3395_p1)
}
  0x51   : > { %s3399_s18 = scalar_lea.vmem %s3787_s17, 64  ;;  %s3605_s23 = smov [#allocation5]  }
  0x52   : > { %p3400_p7 = scmp.ne.s32.totalorder %s3787_s17, %s3399_s18  ;;  %s3404_s24 = sshll.u32 %s3605_s23, 4  ;;  %s3405_s24 = int_to_ptr.vmem [resolvable:$false] %s3404_s24 }
  0x53   : > { %s3406_s26 = scalar_lea.vmem %s3405_s24, 128  ;;  %p3407_p4 = scmp.lt.s32.totalorder %s3787_s17, %s3405_s24 }
  0x54   : > { %p3402_p0 = pnand %p3400_p7, %p3795_p2  ;;  %p3408_p9 = scmp.lt.s32.totalorder %s3406_s26, %s3399_s18 }
  0x56   : > { %p3403_p5 = pneg %p3402_p0  ;;  %p3409_p3 = por %p3408_p9, %p3407_p4 }
  0x58   : > { %p3410_p6 = pnand %p3409_p3, %p3403_p5 }
  0x5a   : > { %3413 = shalt.err (!%p3410_p6)
}
  0x5b   : > { %3220 = dma.hbm_to_vmem [thread:$0]  (!%p3775_p13), %s3784_s9, 64, %s3787_s17, %s3789_s5  }
  0x5c   : > { %s3425_s30 = scalar_lea.vmem %s269_s3, 256  ;;  %p4376_p7 = scmp.ne.s32.totalorder %s4364_s15, 0 }
  0x5d   : > { %p3426_p1 = scmp.ne.s32.totalorder %s269_s3, %s3425_s30  ;;  %p3433_p12 = scmp.lt.s32.totalorder %s269_s3, %s269_s3 }
  0x5e   : > { %p4377_p8 = pneg %p4376_p7  ;;  %p3434_p0 = scmp.lt.s32.totalorder %s3425_s30, %s3425_s30 }
  0x60   : > { %p3428_p10 = pnand %p3426_p1, %p4377_p8  ;;  %p3435_p2 = por %p3434_p0, %p3433_p12 }
  0x62   : > { %p3429_p11 = pneg %p3428_p10 }
  0x64   : > { %p3436_p4 = pnand %p3435_p2, %p3429_p11 }
  0x66   : > { %3439 = shalt.err (!%p3436_p4)
}
  0x67   : > { %s4378_s10 = smov 4   ;;  %s4379_s19 = smov 64  }
  0x68   : > { %3207 = dma.hbm_to_vmem [thread:$0]  (!%p4376_p7), %s4335_s4, 256, %s269_s3, [#allocation9], %s4379_s19, %s4379_s19, %s4378_s10  }
  0x69   : > { %s3606_s17 = smov [#allocation13]   ;;  %p4380_p6 = pmov %p4377_p8 }
  0x6a   : > { %s294_s9 = sshll.u32 %s3606_s17, 4  ;;  %s295_s9 = int_to_ptr.vmem [resolvable:$true] %s294_s9 }
  0x6b   : > { %s3451_s23 = scalar_lea.vmem %s295_s9, 256  ;;  %p3459_p5 = scmp.lt.s32.totalorder %s295_s9, %s295_s9 }
  0x6c   : > { %p3452_p3 = scmp.ne.s32.totalorder %s295_s9, %s3451_s23  ;;  %p3460_p1 = scmp.lt.s32.totalorder %s3451_s23, %s3451_s23 }
  0x6e   : > { %p3454_p9 = pnand %p3452_p3, %p4380_p6  ;;  %p3461_p8 = por %p3460_p1, %p3459_p5 }
  0x70   : > { %p3455_p2 = pneg %p3454_p9 }
  0x72   : > { %p3462_p10 = pnand %p3461_p8, %p3455_p2 }
  0x74   : > { %3465 = shalt.err (!%p3462_p10)
}
  0x75   : > { %3213 = dma.hbm_to_vmem [thread:$0]  (!%p4376_p7), %s4337_s6, 256, %s295_s9, [#allocation12], %s4379_s19, %s4379_s19, %s4378_s10  }
  0x76   : > { %s4381_s0 = sld [smem:[#allocation24_spill]]  ;;  %s315_s15 = scalar_lea.vmem [#allocation2], %s3770_s20 }
  0x77   : > { %s322_s18 = sshll.u32 %s315_s15, 4  ;;  %s4382_s17 = sand.u32 1, %s3594_s29   ;;  %s323_s18 = int_to_ptr.vmem [resolvable:$true] %s322_s18 }
  0x78   : > { %s312_s23 = scalar_lea.sflag [#allocation3], %s4382_s17  ;;  %p4383_p12 = scmp.ne.s32.totalorder %s4375_s25, 0 }
  0x7c   : > { %s3844_s14 = scalar_lea.hbm %s4381_s0, %s3773_s21  ;;  %s3471_s19 = scalar_lea.hbm %s4381_s0, 128 }
  0x7d   : > { %s3466_s1 = scalar_lea.hbm %s3844_s14, 64  ;;  %p3472_p7 = scmp.lt.s32.totalorder %s3844_s14, %s4381_s0 }
  0x7e   : > { %p3467_p11 = scmp.ne.s32.totalorder %s3844_s14, %s3466_s1  ;;  %p3473_p3 = scmp.lt.s32.totalorder %s3471_s19, %s3466_s1 }
  0x80   : > { %p3469_p0 = pnand %p3467_p11, %p4383_p12  ;;  %p3474_p6 = por %p3473_p3, %p3472_p7 }
  0x82   : > { %p3470_p4 = pneg %p3469_p0 }
  0x84   : > { %p3475_p9 = pnand %p3474_p6, %p3470_p4 }
  0x86   : > { %3478 = shalt.err (!%p3475_p9)
}
  0x87   : > { %s3479_s26 = scalar_lea.vmem %s323_s18, 64  ;;  %s3607_s30 = smov [#allocation2]  }
  0x88   : > { %p3480_p2 = scmp.ne.s32.totalorder %s323_s18, %s3479_s26  ;;  %s3484_s15 = sshll.u32 %s3607_s30, 4  ;;  %s3485_s15 = int_to_ptr.vmem [resolvable:$false] %s3484_s15 }
  0x89   : > { %s3486_s17 = scalar_lea.vmem %s3485_s15, 128  ;;  %p3487_p8 = scmp.lt.s32.totalorder %s323_s18, %s3485_s15 }
  0x8a   : > { %p3482_p5 = pnand %p3480_p2, %p4383_p12  ;;  %p3488_p10 = scmp.lt.s32.totalorder %s3486_s17, %s3479_s26 }
  0x8c   : > { %p3483_p1 = pneg %p3482_p5  ;;  %p3489_p11 = por %p3488_p10, %p3487_p8 }
  0x8e   : > { %p3490_p0 = pnand %p3489_p11, %p3483_p1 }
  0x90   : > { %3493 = shalt.err (!%p3490_p0)
}
  0x91   : > { %3217 = dma.hbm_to_vmem [thread:$0]  (!%p3775_p13), %s3844_s14, 64, %s323_s18, %s312_s23  }
  0x92   : > { %s356_s10 = scalar_lea.hbm %s4333_s2, %s3773_s21  ;;  %s351_s19 = scalar_lea.vmem [#allocation7], %s3770_s20 }
  0x93   : > { %s358_s9 = sshll.u32 %s351_s19, 4  ;;  %s3494_s24 = scalar_lea.hbm %s356_s10, 64  ;;  %s359_s9 = int_to_ptr.vmem [resolvable:$true] %s358_s9 }
  0x94   : > { %p3495_p4 = scmp.ne.s32.totalorder %s356_s10, %s3494_s24  ;;  %s3499_s15 = scalar_lea.hbm %s4333_s2, 128 }
  0x95   : > { %p3500_p6 = scmp.lt.s32.totalorder %s356_s10, %s4333_s2  ;;  %p3501_p9 = scmp.lt.s32.totalorder %s3499_s15, %s3494_s24 }
  0x96   : > { %p3497_p7 = pnand %p3495_p4, %p4383_p12 }
  0x97   : > { %p3502_p2 = por %p3501_p9, %p3500_p6 }
  0x98   : > { %p3498_p3 = pneg %p3497_p7 }
  0x9a   : > { %p3503_p5 = pnand %p3502_p2, %p3498_p3 }
  0x9c   : > { %3506 = shalt.err (!%p3503_p5)
}
  0x9d   : > { %s3507_s20 = scalar_lea.vmem %s359_s9, 64  ;;  %s3608_s21 = smov [#allocation7]  }
  0x9e   : > { %p3508_p1 = scmp.ne.s32.totalorder %s359_s9, %s3507_s20  ;;  %s3512_s14 = sshll.u32 %s3608_s21, 4  ;;  %s3513_s14 = int_to_ptr.vmem [resolvable:$false] %s3512_s14 }
  0x9f   : > { %s3514_s18 = scalar_lea.vmem %s3513_s14, 128  ;;  %p3515_p11 = scmp.lt.s32.totalorder %s359_s9, %s3513_s14 }
  0xa0   : > { %p3510_p8 = pnand %p3508_p1, %p4383_p12  ;;  %p3516_p0 = scmp.lt.s32.totalorder %s3514_s18, %s3507_s20 }
  0xa2   : > { %p3511_p10 = pneg %p3510_p8  ;;  %p3517_p4 = por %p3516_p0, %p3515_p11 }
  0xa4   : > { %p3518_p7 = pnand %p3517_p4, %p3511_p10 }
  0xa6   : > { %3521 = shalt.err (!%p3518_p7)
}
  0xa7   : > { %3223 = dma.hbm_to_vmem [thread:$0]  (!%p3775_p13), %s356_s10, 64, %s359_s9, %s3789_s5  }
  0xa8   : > { %p4384_p3 = scmp.ne.s32.totalorder %s4363_s12, 0 }
  0xa9   : > { %s3886_s0 = sand.u32 (!%p4384_p3), 1, %s3590_s28   ;;  %p4385_p12 = scmp.ne.s32.totalorder (!%p4384_p3), %s4369_s13, 0 }
  0xaa   : > { %367 = sbr.rel (%p4384_p3) target bundleno = 1664 (0x680), region = 52  ;;  %s3889_s25 = sshll.u32 (!%p4384_p3), %s3886_s0, 2 }
  0xab   : > { %s370_s23 = scalar_lea.sflag (!%p4384_p3), [#allocation3], %s3886_s0  ;;  %s373_s1 = scalar_lea.vmem (!%p4384_p3), [#allocation2], %s3889_s25 }
  0xaf   : > { %3565 = dma.done.wait (%p4385_p12), %s370_s23, 64  }
  0xb0   : > { %3567 = vsyncadd (%p4385_p12), %s370_s23, 4294967232  ;;  %s378_s5 = sand.u32 1, %s3694_s11   ;;  %s382_s22 = scalar_lea.vmem [#allocation5], %s3889_s25 }
  0xb1   : > { %s379_s12 = scalar_lea.sflag [#allocation6], %s378_s5 }
  0xb2   : > { %3569 = dma.done.wait (%p4385_p12), %s379_s12, 128  }
  0xb3   : > { %3571 = vsyncadd (%p4385_p12), %s379_s12, 4294967168  ;;  %s391_s3 = scalar_lea.vmem [#allocation7], %s3889_s25  ;;  %p4386_p13 = scmp.eq.s32.totalorder %s3694_s11, 0 }
  0xb5   : > { %3573 = dma.done.wait (%p4386_p13), [#allocation9], 512   ;;  %p4387_p6 = pmov %p4386_p13 }
  0xb7   : > { %3575 = vsyncadd (%p4387_p6), [#allocation9], 4294966784  ;;  %p4388_p9 = pmov %p4387_p6 }
  0xb8   : > { %p4389_p2 = pmov %p4387_p6 }
  0xb9   : > { %3577 = dma.done.wait (%p4388_p9), [#allocation12], 512  }
  0xba   : > { %3579 = vsyncadd (%p4389_p2), [#allocation12], 4294966784  ;;  %v3609_v0 = vmov 0.0   ;;  %vm3610_vm0 = vmmov 0   ;;  %v3294_v1 = vld [vmem:[#allocation10 + $0x8] sm:$0xff]   ;;  %v3295_v2 = vld [vmem:[#allocation8 + $0x8] sm:$0xff]   ;;  %v659_v24 = vlaneseq }
  0xbb   : > { %3057 = vmatprep.subr.bf16.mxu1 %v3609_v0  ;;  %3049 = vmatprep.subr.bf16.mxu0 %v3609_v0  ;;  %v3296_v3 = vld [vmem:[#allocation10] sm:$0xff]   ;;  %v3297_v4 = vld [vmem:[#allocation8] sm:$0xff]   ;;  %vm470_vm1 = vcmask 261120   ;;  %v451_v6 = vld [vmem:[%s373_s1] sm:$0xf]  ;;  %s3611_s13 = smov 116  }
  0xbc   : > { %3061 = vmatprep.mubr.msk.bf16.mxu1 %vm3610_vm0, %v3609_v0  ;;  %3053 = vmatprep.mubr.msk.bf16.mxu0 %vm3610_vm0, %v3609_v0  ;;  %v452_v5 = vld [vmem:[%s382_s22] sm:$0xf]  ;;  %v3298_v7 = vld [vmem:[#allocation11 + $0x8] sm:$0xff]   ;;  %v3299_v8 = vld [vmem:[#allocation11] sm:$0xff]   ;;  %s3612_s10 = smov 124   ;;  %s3613_s19 = smov 120  }
  0xbd   : > { %3058 = vmatpush3.bf16.msra.mxu1 %v3294_v1  ;;  %3050 = vmatpush3.bf16.msra.mxu0 %v3295_v2  ;;  %v453_v9 = vld [vmem:[%s391_s3] sm:$0xf]  ;;  %s3614_s9 = smov 112   ;;  %s3615_s24 = smov 108   ;;  %v3618_v22 = vmov 1983009808  }
  0xbe   : > { %3059 = vmatprep.subr.bf16.mxu1 %v3609_v0  ;;  %3051 = vmatprep.subr.bf16.mxu0 %v3609_v0  ;;  %s3616_s26 = smov 104   ;;  %s3617_s30 = smov 100   ;;  %v657_v23 = vunpack.c.l.s4 %v3618_v22  ;;  %v3619_v25 = vmov 1934713408   ;;  %v660_v28 = vshrl.u32 %v659_v24, 7  ;;  %vm1538_vm2 = vcmask 31744  }
  0xbf   : > { %v721_v26 = vunpack.c.l.s4 %v3619_v25  ;;  %vm2007_vm3 = vcmask 1043456   ;;  %vm1907_vm4 = vcmask 64512   ;;  %s3620_s15 = smov 8   ;;  %s3621_s17 = smov 4   ;;  %vm2675_vm5 = vcmask 97280  }
  0xc0   : > { %v658_v27 = vunpack.c.0.s8 %v657_v23  ;;  %s3622_s20 = smov 12   ;;  %s3623_s21 = smov 20   ;;  %vm2677_vm6 = vcmask 130048   ;;  %vm2679_vm7 = vcmask 162816   ;;  %vm2681_vm8 = vcmask 195584  }
  0xc1   : > { %3060 = vmatpush3.bf16.msra.mxu1 %v3296_v3  ;;  %3052 = vmatpush3.bf16.msra.mxu0 %v3297_v4  ;;  %v722_v31 = vunpack.c.0.s8 %v721_v26  ;;  %s3624_s14 = smov 16   ;;  %s3625_s18 = smov 28   ;;  %vm2683_vm9 = vcmask 228352  }
  0xc2   : > { %3073 = vmatprep.subr.bf16.mxu1 %v3609_v0  ;;  %3065 = vmatprep.subr.bf16.mxu0 %v3609_v0  ;;  %v3960_v32 = vsub.s32 %v658_v27, %v660_v28  ;;  %s3626_s25 = smov 24   ;;  %s2939_s23 = sshll.u32 %s3886_s0, 3 }
  0xc3   : > { %v3962_v39 = vsub.s32 %v722_v31, %v660_v28  ;;  %s3002_s12 = sshll.u32 %s3694_s11, 7  ;;  %s449_s22 = scalar_lea.vmem [#allocation14], %s2939_s23 }
  0xc4   : > { %3062 = vmatmul.mubr.msk.bf16.vlgmr.msra.gmra.mxu1 %vm470_vm1, %v452_v5  ;;  %3054 = vmatmul.mubr.msk.bf16.vlgmr.msra.gmra.mxu0 %vm470_vm1, %v451_v6  ;;  %s2767_s3 = sshll.u32 %s449_s22, 4  ;;  %p4390_p1 = scmp.ne.s32.totalorder %s4370_s16, 0  ;;  %s4290_s3 = int_to_ptr.vmem [resolvable:$true] %s2767_s3 }
  0xc5   : > { %3075 = vmatprep.mubr.msk.bf16.mxu1 %vm3610_vm0, %v3609_v0  ;;  %3066 = vmatpush3.bf16.msra.mxu0 %v3298_v7  ;;  %s3627_s11 = smov [#allocation14]  }
  0xc6   : > { %3069 = vmatprep.mubr.msk.bf16.mxu0 %vm3610_vm0, %v3609_v0  ;;  %3067 = vmatprep.subr.bf16.mxu0 %v3609_v0 }
  0xc9   : > { %3068 = vmatpush3.bf16.msra.mxu0 %v3299_v8 }
  0xca   : > { %3079 = vmatprep.subr.bf16.mxu0 %v3609_v0 }
  0xcc   : > { %3070 = vmatmul.mubr.msk.bf16.vlgmr.msra.gmra.mxu0 %vm470_vm1, %v453_v9 }
  0xcd   : > { %3081 = vmatprep.mubr.msk.bf16.mxu0 %vm3610_vm0, %v3609_v0 }
 0x184   : > { %v567_v10 = vpop.f32.mrf.mxu1  ;;  %v3936_v11 = vpop.f32.mrf.mxu0 }
 0x185   : > { %941 = vrot.lane.b32.xlu1 %v567_v10, %s3611_s13  ;;  %935 = vrot.lane.b32.xlu0 %v567_v10, %s3612_s10 }
 0x186   : > { %v3063_v12 = vpop.f32.mrf.mxu1  ;;  %v3055_v13 = vpop.f32.mrf.mxu0 }
 0x188   : > { %v570_v14 = vpop.f32.mrf.mxu1  ;;  %v511_v15 = vpop.f32.mrf.mxu0 }
 0x189   : > { %938 = vrot.lane.b32.xlu0 %v567_v10, %s3613_s19  ;;  %633 = vrot.lane.b32.xlu1 %v3936_v11, %s3612_s10 }
 0x18a   : > { %v3064_v16 = vpop.f32.mrf.mxu1  ;;  %v3056_v17 = vpop.f32.mrf.mxu0 }
 0x18c   : > { %v3954_v18 = vpop.f32.mrf.mxu0 }
 0x18d   : > { %636 = vrot.lane.b32.xlu0 %v3936_v11, %s3613_s19  ;;  %639 = vrot.lane.b32.xlu1 %v3936_v11, %s3611_s13 }
 0x18e   : > { %v3071_v19 = vpop.f32.mrf.mxu0 }
 0x190   : > { %v629_v20 = vpop.f32.mrf.mxu0 }
 0x191   : > { %944 = vrot.lane.b32.xlu0 %v567_v10, %s3614_s9  ;;  %947 = vrot.lane.b32.xlu1 %v567_v10, %s3615_s24 }
 0x192   : > { %v3072_v21 = vpop.f32.mrf.mxu0 }
 0x195   : > { %950 = vrot.lane.b32.xlu0 %v567_v10, %s3616_s26  ;;  %953 = vrot.lane.b32.xlu1 %v567_v10, %s3617_s30 }
 0x199   : > { %642 = vrot.lane.b32.xlu0 %v3936_v11, %s3614_s9  ;;  %645 = vrot.lane.b32.xlu1 %v3936_v11, %s3615_s24 }
 0x19d   : > { %648 = vrot.lane.b32.xlu0 %v3936_v11, %s3616_s26  ;;  %651 = vrot.lane.b32.xlu1 %v3936_v11, %s3617_s30 }
 0x1a1   : > { %1237 = vrot.lane.b32.xlu1 %v3954_v18, %s3612_s10  ;;  %1240 = vrot.lane.b32.xlu0 %v3954_v18, %s3613_s19  ;;  %s4288_s19 = scalar_lea.hbm %s4339_s8, %s3002_s12 }
 0x1a5   : > { %1243 = vrot.lane.b32.xlu1 %v3954_v18, %s3611_s13 }
 0x1f7   : > { %v942_v29 = vpop.permute.xlu1 %941  ;;  %v936_v30 = vpop.permute.xlu0 %935 }
 0x1f8   : > { %v972_v33 = vcombine.low %v936_v30, %v942_v29  ;;  %v973_v34 = vcombine.high %v936_v30, %v942_v29 }
 0x1fa   : > { %v980_v40 = vrot.slane %v972_v33, %v3960_v32  ;;  %v987_v41 = vrot.slane %v973_v34, %v3960_v32 }
 0x1fb   : > { %v939_v35 = vpop.permute.xlu0 %938  ;;  %v634_v36 = vpop.permute.xlu1 %633 }
 0x1fc   : > { %v956_v37 = vcombine.low %v567_v10, %v939_v35  ;;  %v957_v38 = vcombine.high %v567_v10, %v939_v35 }
 0x1fe   : > { %v964_v42 = vrot.slane %v956_v37, %v3960_v32  ;;  %v971_v43 = vrot.slane %v957_v38, %v3960_v32 }
 0x1ff   : > { %v637_v44 = vpop.permute.xlu0 %636  ;;  %v640_v45 = vpop.permute.xlu1 %639 }
 0x200   : > { %v1020_v46 = vcombine.low %v964_v42, %v980_v40  ;;  %v1021_v47 = vcombine.high %v964_v42, %v980_v40  ;;  %v1036_v48 = vcombine.low %v971_v43, %v987_v41  ;;  %v1037_v49 = vcombine.high %v971_v43, %v987_v41 }
 0x201   : > { %v654_v50 = vcombine.low %v3936_v11, %v637_v44  ;;  %v655_v51 = vcombine.high %v3936_v11, %v637_v44  ;;  %v670_v52 = vcombine.low %v634_v36, %v640_v45  ;;  %v671_v53 = vcombine.high %v634_v36, %v640_v45 }
 0x202   : > { %v1028_v54 = vrot.slane %v1020_v46, %v3962_v39  ;;  %v1035_v55 = vrot.slane %v1021_v47, %v3962_v39  ;;  %v1044_v56 = vrot.slane %v1036_v48, %v3962_v39  ;;  %v1051_v57 = vrot.slane %v1037_v49, %v3962_v39 }
 0x203   : > { %v662_v58 = vrot.slane %v654_v50, %v3960_v32  ;;  %v669_v59 = vrot.slane %v655_v51, %v3960_v32  ;;  %v678_v60 = vrot.slane %v670_v52, %v3960_v32  ;;  %v685_v61 = vrot.slane %v671_v53, %v3960_v32  ;;  %v945_v62 = vpop.permute.xlu0 %944  ;;  %v948_v63 = vpop.permute.xlu1 %947 }
 0x204   : > { %v2957_v1 = vcombine.low %v1028_v54, %v1035_v55  ;;  %v2959_v2 = vcombine.high %v1028_v54, %v1035_v55  ;;  %v2961_v3 = vcombine.low %v1044_v56, %v1051_v57  ;;  %v2963_v4 = vcombine.high %v1044_v56, %v1051_v57 }
 0x205   : > { %v718_v5 = vcombine.low %v662_v58, %v678_v60  ;;  %v719_v6 = vcombine.high %v662_v58, %v678_v60  ;;  %v734_v7 = vcombine.low %v669_v59, %v685_v61  ;;  %v735_v8 = vcombine.high %v669_v59, %v685_v61 }
 0x206   : > { %v3979_v9 = vrot.slane %v2957_v1, %v3960_v32  ;;  %v3982_v10 = vrot.slane %v2959_v2, %v3960_v32  ;;  %v3985_v11 = vrot.slane %v2961_v3, %v3960_v32  ;;  %v3988_v12 = vrot.slane %v2963_v4, %v3960_v32 }
 0x207   : > { %v726_v13 = vrot.slane %v718_v5, %v3962_v39  ;;  %v733_v14 = vrot.slane %v719_v6, %v3962_v39  ;;  %v742_v15 = vrot.slane %v734_v7, %v3962_v39  ;;  %v749_v16 = vrot.slane %v735_v8, %v3962_v39  ;;  %v951_v17 = vpop.permute.xlu0 %950  ;;  %v954_v19 = vpop.permute.xlu1 %953 }
 0x208   : > { %v988_v20 = vcombine.low %v945_v62, %v951_v17  ;;  %v989_v21 = vcombine.high %v945_v62, %v951_v17  ;;  %v1004_v22 = vcombine.low %v948_v63, %v954_v19  ;;  %v1005_v23 = vcombine.high %v948_v63, %v954_v19 }
 0x209   : > { %v2949_v24 = vcombine.low %v726_v13, %v733_v14  ;;  %v2951_v25 = vcombine.high %v726_v13, %v733_v14  ;;  %v2953_v26 = vcombine.low %v742_v15, %v749_v16  ;;  %v2955_v27 = vcombine.high %v742_v15, %v749_v16 }
 0x20a   : > { %v996_v28 = vrot.slane %v988_v20, %v3960_v32  ;;  %v1003_v29 = vrot.slane %v989_v21, %v3960_v32  ;;  %v1012_v30 = vrot.slane %v1004_v22, %v3960_v32  ;;  %v1019_v31 = vrot.slane %v1005_v23, %v3960_v32 }
 0x20b   : > { %v3999_v33 = vrot.slane %v2949_v24, %v3960_v32  ;;  %v4002_v34 = vrot.slane %v2951_v25, %v3960_v32  ;;  %v4005_v35 = vrot.slane %v2953_v26, %v3960_v32  ;;  %v4008_v36 = vrot.slane %v2955_v27, %v3960_v32  ;;  %v643_v37 = vpop.permute.xlu0 %642  ;;  %v646_v38 = vpop.permute.xlu1 %645 }
 0x20c   : > { %v1052_v40 = vcombine.low %v996_v28, %v1012_v30  ;;  %v1053_v41 = vcombine.high %v996_v28, %v1012_v30  ;;  %v1068_v42 = vcombine.low %v1003_v29, %v1019_v31  ;;  %v1069_v43 = vcombine.high %v1003_v29, %v1019_v31 }
 0x20d   : > { %v854_v44 = vcombine.low %v3999_v33, %v4002_v34  ;;  %v886_v45 = vcombine.low %v4005_v35, %v4008_v36  ;;  %v1156_v52 = vcombine.low %v3979_v9, %v3982_v10  ;;  %v1188_v53 = vcombine.low %v3985_v11, %v3988_v12 }
 0x20e   : > { %v1060_v46 = vrot.slane %v1052_v40, %v3962_v39  ;;  %v1067_v47 = vrot.slane %v1053_v41, %v3962_v39  ;;  %v1076_v50 = vrot.slane %v1068_v42, %v3962_v39  ;;  %v1083_v51 = vrot.slane %v1069_v43, %v3962_v39 }
 0x20f   : > { %v649_v48 = vpop.permute.xlu0 %648  ;;  %v652_v49 = vpop.permute.xlu1 %651  ;;  %v855_v58 = vcombine.high %v3999_v33, %v4002_v34  ;;  %v862_v60 = vrot.slane %v854_v44, %v3962_v39  ;;  %v894_v61 = vrot.slane %v886_v45, %v3962_v39  ;;  %v1164_v5 = vrot.slane %v1156_v52, %v3962_v39 }
 0x210   : > { %v686_v54 = vcombine.low %v643_v37, %v649_v48  ;;  %v687_v55 = vcombine.high %v643_v37, %v649_v48  ;;  %v702_v56 = vcombine.low %v646_v38, %v652_v49  ;;  %v703_v57 = vcombine.high %v646_v38, %v652_v49 }
 0x211   : > { %v2958_v59 = vcombine.low %v1060_v46, %v1067_v47  ;;  %v2960_v3 = vcombine.high %v1060_v46, %v1067_v47  ;;  %v2962_v4 = vcombine.low %v1076_v50, %v1083_v51  ;;  %v1196_v6 = vrot.slane %v1188_v53, %v3962_v39 }
 0x212   : > { %v694_v62 = vrot.slane %v686_v54, %v3960_v32  ;;  %v701_v63 = vrot.slane %v687_v55, %v3960_v32  ;;  %v710_v1 = vrot.slane %v702_v56, %v3960_v32  ;;  %v717_v2 = vrot.slane %v703_v57, %v3960_v32 }
 0x213   : > { %v887_v15 = vcombine.high %v4005_v35, %v4008_v36  ;;  %v2964_v16 = vcombine.high %v1076_v50, %v1083_v51  ;;  %v1220_v17 = vcombine.low %v1164_v5, %v1196_v6  ;;  %v1221_v19 = vcombine.high %v1164_v5, %v1196_v6 }
 0x214   : > { %v750_v7 = vcombine.low %v694_v62, %v710_v1  ;;  %v751_v8 = vcombine.high %v694_v62, %v710_v1  ;;  %v766_v13 = vcombine.low %v701_v63, %v717_v2  ;;  %v767_v14 = vcombine.high %v701_v63, %v717_v2 }
 0x215   : > { %v1228_v24 = vpack.c.bf16 %v1220_v17, %v1220_v17  ;;  %v1229_v25 = vpack.c.bf16 %v1221_v19, %v1221_v19  ;;  %v1157_v26 = vcombine.high %v3979_v9, %v3982_v10  ;;  %v1189_v27 = vcombine.high %v3985_v11, %v3988_v12 }
 0x216   : > { %v758_v20 = vrot.slane %v750_v7, %v3962_v39  ;;  %v765_v21 = vrot.slane %v751_v8, %v3962_v39  ;;  %v774_v22 = vrot.slane %v766_v13, %v3962_v39  ;;  %v781_v23 = vrot.slane %v767_v14, %v3962_v39 }
 0x217   : > { %v1107_v28 = vrot.slane %v2958_v59, %v3960_v32  ;;  %v1123_v29 = vrot.slane %v2960_v3, %v3960_v32  ;;  %v1139_v30 = vrot.slane %v2962_v4, %v3960_v32  ;;  %v918_v31 = vcombine.low %v862_v60, %v894_v61 }
 0x218   : > { %v1543_v33 = vsel %vm1538_vm2, %v1228_v24, 0  ;;  %v1589_v34 = vsel %vm1538_vm2, %v1229_v25, 0  ;;  %v1171_v35 = vrot.slane %v1157_v26, %v3962_v39  ;;  %v1203_v36 = vrot.slane %v1189_v27, %v3962_v39  ;;  %v1238_v25 = vpop.permute.xlu1 %1237  ;;  %v1241_v26 = vpop.permute.xlu0 %1240 }
 0x219   : > { %v1155_v9 = vrot.slane %v2964_v16, %v3960_v32  ;;  %v2950_v10 = vcombine.low %v758_v20, %v765_v21  ;;  %v2952_v37 = vcombine.high %v758_v20, %v765_v21  ;;  %v2954_v11 = vcombine.low %v774_v22, %v781_v23  ;;  %3074 = vmatpush3.bf16.xpose.msra.mxu1 %v1543_v33 }
 0x21a   : > { %v2956_v12 = vcombine.high %v774_v22, %v781_v23  ;;  %3080 = vmatpush3.bf16.xpose.msra.mxu0 %v1589_v34  ;;  %3085 = vmatprep.subr.bf16.mxu1 %v3609_v0  ;;  %v1222_v38 = vcombine.low %v1171_v35, %v1203_v36  ;;  %v1223_v40 = vcombine.high %v1171_v35, %v1203_v36 }
 0x21b   : > { %v919_v41 = vcombine.high %v862_v60, %v894_v61  ;;  %3091 = vmatprep.subr.bf16.mxu0 %v3609_v0  ;;  %v926_v42 = vpack.c.bf16 %v918_v31, %v918_v31  ;;  %v1172_v44 = vcombine.low %v1107_v28, %v1123_v29  ;;  %v805_v45 = vrot.slane %v2950_v10, %v3960_v32 }
 0x21c   : > { %v1230_v43 = vpack.c.bf16 %v1222_v38, %v1222_v38  ;;  %v821_v46 = vrot.slane %v2952_v37, %v3960_v32  ;;  %v1231_v47 = vpack.c.bf16 %v1223_v40, %v1223_v40  ;;  %v1204_v48 = vcombine.low %v1139_v30, %v1155_v9 }
 0x21d   : > { %v837_v49 = vrot.slane %v2954_v11, %v3960_v32  ;;  %v853_v50 = vrot.slane %v2956_v12, %v3960_v32  ;;  %v869_v51 = vrot.slane %v855_v58, %v3962_v39  ;;  %v901_v52 = vrot.slane %v887_v15, %v3962_v39 }
 0x21e   : > { %v927_v53 = vpack.c.bf16 %v919_v41, %v919_v41  ;;  %v1180_v54 = vrot.slane %v1172_v44, %v3962_v39  ;;  %v1212_v55 = vrot.slane %v1204_v48, %v3962_v39  ;;  %v1635_v56 = vsel %vm1538_vm2, %v1230_v43, 0 }
 0x21f   : > { %v1173_v57 = vcombine.high %v1107_v28, %v1123_v29  ;;  %v1205_v59 = vcombine.high %v1139_v30, %v1155_v9  ;;  %v1681_v60 = vsel %vm1538_vm2, %v1231_v47, 0  ;;  %v870_v62 = vcombine.low %v805_v45, %v821_v46  ;;  %v1244_v9 = vpop.permute.xlu1 %1243 }
 0x220   : > { %3076 = vmatmul.mubr.msk.bf16.vlgmr.msra.gmra.mxu1 %vm1538_vm2, %v926_v42  ;;  %v1224_v61 = vcombine.low %v1180_v54, %v1212_v55  ;;  %v1225_v58 = vcombine.high %v1180_v54, %v1212_v55  ;;  %v902_v63 = vcombine.low %v837_v49, %v853_v50  ;;  %v920_v1 = vcombine.low %v869_v51, %v901_v52 }
 0x221   : > { %3082 = vmatmul.mubr.msk.bf16.vlgmr.msra.gmra.mxu0 %vm1538_vm2, %v927_v53  ;;  %3086 = vmatpush3.bf16.xpose.msra.mxu1 %v1635_v56  ;;  %v921_v2 = vcombine.high %v869_v51, %v901_v52  ;;  %v1187_v4 = vrot.slane %v1173_v57, %v3962_v39  ;;  %v1219_v5 = vrot.slane %v1205_v59, %v3962_v39 }
 0x222   : > { %3092 = vmatpush3.bf16.xpose.msra.mxu0 %v1681_v60  ;;  %3087 = vmatprep.mubr.msk.bf16.mxu1 %vm3610_vm0, %v3609_v0  ;;  %v1232_v3 = vpack.c.bf16 %v1224_v61, %v1224_v61  ;;  %v1233_v6 = vpack.c.bf16 %v1225_v58, %v1225_v58  ;;  %v928_v7 = vpack.c.bf16 %v920_v1, %v920_v1 }
 0x223   : > { %3093 = vmatprep.mubr.msk.bf16.mxu0 %vm3610_vm0, %v3609_v0  ;;  %3097 = vmatprep.subr.bf16.mxu1 %v3609_v0  ;;  %v878_v8 = vrot.slane %v870_v62, %v3962_v39  ;;  %v910_v13 = vrot.slane %v902_v63, %v3962_v39  ;;  %v929_v14 = vpack.c.bf16 %v921_v2, %v921_v2 }
 0x224   : > { %3103 = vmatprep.subr.bf16.mxu0 %v3609_v0  ;;  %v1727_v15 = vsel %vm1538_vm2, %v1232_v3, 0  ;;  %v1226_v16 = vcombine.low %v1187_v4, %v1219_v5  ;;  %v1773_v17 = vsel %vm1538_vm2, %v1233_v6, 0  ;;  %v1227_v19 = vcombine.high %v1187_v4, %v1219_v5 }
 0x225   : > { %v871_v20 = vcombine.high %v805_v45, %v821_v46  ;;  %v903_v21 = vcombine.high %v837_v49, %v853_v50  ;;  %v922_v22 = vcombine.low %v878_v8, %v910_v13  ;;  %v923_v23 = vcombine.high %v878_v8, %v910_v13 }
 0x226   : > { %v1234_v24 = vpack.c.bf16 %v1226_v16, %v1226_v16  ;;  %v1235_v27 = vpack.c.bf16 %v1227_v19, %v1227_v19  ;;  %v1258_v28 = vcombine.low %v3954_v18, %v1241_v26  ;;  %v1259_v29 = vcombine.high %v3954_v18, %v1241_v26 }
 0x227   : > { %v930_v30 = vpack.c.bf16 %v922_v22, %v922_v22  ;;  %v885_v31 = vrot.slane %v871_v20, %v3962_v39  ;;  %v917_v33 = vrot.slane %v903_v21, %v3962_v39  ;;  %v931_v34 = vpack.c.bf16 %v923_v23, %v923_v23 }
 0x228   : > { %3088 = vmatmul.mubr.msk.bf16.vlgmr.msra.gmra.mxu1 %vm1538_vm2, %v928_v7  ;;  %v1819_v35 = vsel %vm1538_vm2, %v1234_v24, 0  ;;  %v1266_v36 = vrot.slane %v1258_v28, %v3960_v32  ;;  %v1865_v10 = vsel %vm1538_vm2, %v1235_v27, 0  ;;  %v1273_v37 = vrot.slane %v1259_v29, %v3960_v32 }
 0x229   : > { %3094 = vmatmul.mubr.msk.bf16.vlgmr.msra.gmra.mxu0 %vm1538_vm2, %v929_v14  ;;  %3098 = vmatpush3.bf16.xpose.msra.mxu1 %v1727_v15  ;;  %v1274_v11 = vcombine.low %v1238_v25, %v1244_v9  ;;  %v1275_v12 = vcombine.high %v1238_v25, %v1244_v9  ;;  %v924_v38 = vcombine.low %v885_v31, %v917_v33 }
 0x22a   : > { %3104 = vmatpush3.bf16.xpose.msra.mxu0 %v1773_v17  ;;  %3099 = vmatprep.mubr.msk.bf16.mxu1 %vm3610_vm0, %v3609_v0  ;;  %v925_v40 = vcombine.high %v885_v31, %v917_v33 }
 0x22b   : > { %3105 = vmatprep.mubr.msk.bf16.mxu0 %vm3610_vm0, %v3609_v0  ;;  %3109 = vmatprep.subr.bf16.mxu1 %v3609_v0  ;;  %v1282_v41 = vrot.slane %v1274_v11, %v3960_v32  ;;  %v1289_v42 = vrot.slane %v1275_v12, %v3960_v32  ;;  %v932_v47 = vpack.c.bf16 %v924_v38, %v924_v38 }
 0x22c   : > { %3115 = vmatprep.subr.bf16.mxu0 %v3609_v0  ;;  %v933_v48 = vpack.c.bf16 %v925_v40, %v925_v40 }
 0x22d   : > { %v1322_v43 = vcombine.low %v1266_v36, %v1282_v41  ;;  %v1323_v44 = vcombine.high %v1266_v36, %v1282_v41  ;;  %v1338_v45 = vcombine.low %v1273_v37, %v1289_v42  ;;  %v1339_v46 = vcombine.high %v1273_v37, %v1289_v42 }
 0x22f   : > { %v1330_v49 = vrot.slane %v1322_v43, %v3962_v39  ;;  %v1337_v50 = vrot.slane %v1323_v44, %v3962_v39  ;;  %v1346_v51 = vrot.slane %v1338_v45, %v3962_v39  ;;  %v1353_v52 = vrot.slane %v1339_v46, %v3962_v39 }
 0x230   : > { %3100 = vmatmul.mubr.msk.bf16.vlgmr.msra.gmra.mxu1 %vm1538_vm2, %v930_v30 }
 0x231   : > { %3106 = vmatmul.mubr.msk.bf16.vlgmr.msra.gmra.mxu0 %vm1538_vm2, %v931_v34  ;;  %3110 = vmatpush3.bf16.xpose.msra.mxu1 %v1819_v35  ;;  %v2965_v53 = vcombine.low %v1330_v49, %v1337_v50  ;;  %v2967_v54 = vcombine.high %v1330_v49, %v1337_v50  ;;  %v2969_v55 = vcombine.low %v1346_v51, %v1353_v52 }
 0x232   : > { %3116 = vmatpush3.bf16.xpose.msra.mxu0 %v1865_v10  ;;  %3111 = vmatprep.mubr.msk.bf16.mxu1 %vm3610_vm0, %v3609_v0  ;;  %v2971_v56 = vcombine.high %v1346_v51, %v1353_v52 }
 0x233   : > { %3117 = vmatprep.mubr.msk.bf16.mxu0 %vm3610_vm0, %v3609_v0  ;;  %3121 = vmatprep.subr.bf16.mxu1 %v3609_v0  ;;  %v1402_v57 = vrot.slane %v2965_v53, %v3960_v32  ;;  %v1418_v59 = vrot.slane %v2967_v54, %v3960_v32  ;;  %v1434_v60 = vrot.slane %v2969_v55, %v3960_v32 }
 0x234   : > { %3127 = vmatprep.subr.bf16.mxu0 %v3609_v0  ;;  %v1450_v61 = vrot.slane %v2971_v56, %v3960_v32 }
 0x235   : > { %v1458_v58 = vcombine.low %v1402_v57, %v1418_v59  ;;  %v1459_v8 = vcombine.high %v1402_v57, %v1418_v59 }
 0x236   : > { %v1490_v62 = vcombine.low %v1434_v60, %v1450_v61  ;;  %v1491_v13 = vcombine.high %v1434_v60, %v1450_v61 }
 0x237   : > { %v1466_v63 = vrot.slane %v1458_v58, %v3962_v39  ;;  %v1473_v14 = vrot.slane %v1459_v8, %v3962_v39 }
 0x238   : > { %3112 = vmatmul.mubr.msk.bf16.vlgmr.msra.gmra.mxu1 %vm1538_vm2, %v932_v47  ;;  %v1498_v1 = vrot.slane %v1490_v62, %v3962_v39  ;;  %v1505_v15 = vrot.slane %v1491_v13, %v3962_v39 }
 0x239   : > { %3118 = vmatmul.mubr.msk.bf16.vlgmr.msra.gmra.mxu0 %vm1538_vm2, %v933_v48  ;;  %3123 = vmatprep.mubr.msk.bf16.mxu1 %vm3610_vm0, %v3609_v0 }
 0x23a   : > { %3129 = vmatprep.mubr.msk.bf16.mxu0 %vm3610_vm0, %v3609_v0  ;;  %v1522_v2 = vcombine.low %v1466_v63, %v1498_v1  ;;  %v1523_v3 = vcombine.high %v1466_v63, %v1498_v1  ;;  %v4124_v16 = vcombine.low %v1473_v14, %v1505_v15  ;;  %v4126_v17 = vcombine.high %v1473_v14, %v1505_v15 }
 0x23c   : > { %v1530_v4 = vpack.c.bf16 %v1522_v2, %v1522_v2  ;;  %v1531_v5 = vpack.c.bf16 %v1523_v3, %v1523_v3 }
 0x23e   : > { %v2009_v6 = vsel %vm2007_vm3, %v1530_v4, 0  ;;  %v2055_v7 = vsel %vm2007_vm3, %v1531_v5, 0 }
 0x23f   : > { %3122 = vmatpush3.bf16.msra.mxu1 %v2009_v6  ;;  %3128 = vmatpush3.bf16.msra.mxu0 %v2055_v7 }
 0x240   : > { %3133 = vmatprep.subr.bf16.mxu1 %v3609_v0  ;;  %3139 = vmatprep.subr.bf16.mxu0 %v3609_v0 }
 0x2e0   : > { %v1579_v19 = vpop.f32.mrf.mxu1 }
 0x2e1   : > { %v1625_v20 = vpop.f32.mrf.mxu0  ;;  %v1908_v21 = vsel %vm1907_vm4, %v1579_v19, -inf }
 0x2e2   : > { %v3077_v22 = vpop.f32.mrf.mxu1  ;;  %1909 = vmax.xlane.f32.xlu0 %v1908_v21  ;;  %v1911_v23 = vsel %vm1907_vm4, %v1625_v20, -inf }
 0x2e3   : > { %1912 = vmax.xlane.f32.xlu1 %v1911_v23  ;;  %v3083_v24 = vpop.f32.mrf.mxu0 }
 0x2e4   : > { %v1582_v25 = vpop.f32.mrf.mxu1 }
 0x2e5   : > { %v1628_v26 = vpop.f32.mrf.mxu0 }
 0x2e6   : > { %v3078_v27 = vpop.f32.mrf.mxu1 }
 0x2e7   : > { %v3084_v28 = vpop.f32.mrf.mxu0 }
 0x2e8   : > { %v1671_v29 = vpop.f32.mrf.mxu1 }
 0x2e9   : > { %v1717_v30 = vpop.f32.mrf.mxu0  ;;  %v1914_v31 = vsel %vm1907_vm4, %v1671_v29, -inf }
 0x2ea   : > { %v3089_v33 = vpop.f32.mrf.mxu1  ;;  %1915 = vmax.xlane.f32.xlu0 %v1914_v31  ;;  %v1917_v9 = vsel %vm1907_vm4, %v1717_v30, -inf }
 0x2eb   : > { %v3095_v34 = vpop.f32.mrf.mxu0 }
 0x2ec   : > { %v1674_v35 = vpop.f32.mrf.mxu1 }
 0x2ed   : > { %v1720_v36 = vpop.f32.mrf.mxu0 }
 0x2ee   : > { %v3090_v10 = vpop.f32.mrf.mxu1  ;;  %1918 = vmax.xlane.f32.xlu0 %v1917_v9 }
 0x2ef   : > { %v3096_v37 = vpop.f32.mrf.mxu0 }
 0x2f0   : > { %v1763_v11 = vpop.f32.mrf.mxu1 }
 0x2f1   : > { %v1809_v12 = vpop.f32.mrf.mxu0  ;;  %v1920_v38 = vsel %vm1907_vm4, %v1763_v11, -inf }
 0x2f2   : > { %v3101_v40 = vpop.f32.mrf.mxu1  ;;  %1921 = vmax.xlane.f32.xlu1 %v1920_v38  ;;  %v1923_v41 = vsel %vm1907_vm4, %v1809_v12, -inf }
 0x2f3   : > { %1924 = vmax.xlane.f32.xlu0 %v1923_v41  ;;  %v3107_v42 = vpop.f32.mrf.mxu0 }
 0x2f4   : > { %v1766_v43 = vpop.f32.mrf.mxu1 }
 0x2f5   : > { %v1812_v44 = vpop.f32.mrf.mxu0 }
 0x2f6   : > { %v3102_v45 = vpop.f32.mrf.mxu1 }
 0x2f7   : > { %v3108_v46 = vpop.f32.mrf.mxu0 }
 0x2f8   : > { %v4134_v47 = vpop.f32.mrf.mxu1 }
 0x2f9   : > { %v1901_v48 = vpop.f32.mrf.mxu0  ;;  %v1926_v49 = vsel %vm1907_vm4, %v4134_v47, -inf }
 0x2fa   : > { %v3113_v50 = vpop.f32.mrf.mxu1  ;;  %1927 = vmax.xlane.f32.xlu1 %v1926_v49  ;;  %v1929_v51 = vsel %vm1907_vm4, %v1901_v48, -inf }
 0x2fb   : > { %1930 = vmax.xlane.f32.xlu0 %v1929_v51  ;;  %v3119_v52 = vpop.f32.mrf.mxu0  ;;  %v1533_v50 = vpack.c.bf16 %v4126_v17, %v4126_v17 }
 0x2fc   : > { %v1858_v53 = vpop.f32.mrf.mxu1 }
 0x2fd   : > { %v1904_v54 = vpop.f32.mrf.mxu0 }
 0x2fe   : > { %v3114_v55 = vpop.f32.mrf.mxu1 }
 0x2ff   : > { %v3120_v56 = vpop.f32.mrf.mxu0  ;;  %v2147_v55 = vsel %vm2007_vm3, %v1533_v50, 0 }
 0x30b   : > { %1249 = vrot.lane.b32.xlu1 %v3954_v18, %s3615_s24  ;;  %s3522_s24 = scalar_lea.vmem %s4290_s3, 128 }
 0x30c   : > { %p3523_p5 = scmp.ne.s32.totalorder %s4290_s3, %s3522_s24 }
 0x30e   : > { %p3524_p8 = pnand %p3523_p5, %p4390_p1 }
 0x310   : > { %p3525_p10 = pneg %p3524_p8 }
 0x311   : > { %1246 = vrot.lane.b32.xlu0 %v3954_v18, %s3614_s9  ;;  %s2754_s9 = scalar_lea.sflag [#allocation4], %s3886_s0 }
 0x36b   : > { %v1910_v57 = vpop.xlane.xlu0 %1909 }
 0x36c   : > { %v1932_v59 = vsub.f32 %v1579_v19, %v1910_v57  ;;  %v1913_v60 = vpop.xlane.xlu1 %1912 }
 0x36d   : > { %v1933_v61 = vsub.f32 %v1625_v20, %v1913_v60 }
 0x36e   : > { %v1940_v58 = vmul.f32 1.442695, %v1932_v59 }
 0x36f   : > { %v1942_v62 = vmul.f32 1.442695, %v1933_v61 }
 0x370   : > { %3302 = vpow2.f32 %v1940_v58 }
 0x371   : > { %3304 = vpow2.f32 %v1942_v62 }
 0x373   : > { %v1916_v63 = vpop.xlane.xlu0 %1915 }
 0x374   : > { %v1934_v1 = vsub.f32 %v1671_v29, %v1916_v63 }
 0x376   : > { %v1944_v2 = vmul.f32 1.442695, %v1934_v1 }
 0x377   : > { %v1919_v3 = vpop.xlane.xlu0 %1918 }
 0x378   : > { %3306 = vpow2.f32 %v1944_v2  ;;  %v1935_v4 = vsub.f32 %v1717_v30, %v1919_v3 }
 0x37a   : > { %v1946_v5 = vmul.f32 1.442695, %v1935_v4 }
 0x37b   : > { %v1922_v6 = vpop.xlane.xlu1 %1921 }
 0x37c   : > { %3308 = vpow2.f32 %v1946_v5  ;;  %v1936_v7 = vsub.f32 %v1763_v11, %v1922_v6  ;;  %v1925_v8 = vpop.xlane.xlu0 %1924 }
 0x37d   : > { %v3303_v13 = vpop.eup %3302  ;;  %v1937_v14 = vsub.f32 %v1809_v12, %v1925_v8 }
 0x37e   : > { %v3305_v15 = vpop.eup %3304  ;;  %v1948_v19 = vmul.f32 1.442695, %v1936_v7  ;;  %v1956_v20 = vsel %vm1907_vm4, %v3303_v13, 0.0 }
 0x37f   : > { %v1950_v21 = vmul.f32 1.442695, %v1937_v14  ;;  %1957 = vadd.xlane.f32.xlu1 %v1956_v20  ;;  %v1959_v22 = vsel %vm1907_vm4, %v3305_v15, 0.0 }
 0x380   : > { %3310 = vpow2.f32 %v1948_v19  ;;  %1960 = vadd.xlane.f32.xlu0 %v1959_v22 }
 0x381   : > { %3312 = vpow2.f32 %v1950_v21 }
 0x383   : > { %v1928_v33 = vpop.xlane.xlu1 %1927 }
 0x384   : > { %v1931_v31 = vpop.xlane.xlu0 %1930  ;;  %v1938_v35 = vsub.f32 %v4134_v47, %v1928_v33  ;;  %v1532_v47 = vpack.c.bf16 %v4124_v16, %v4124_v16 }
 0x385   : > { %v4145_v23 = vpop.eup %3306  ;;  %v1939_v34 = vsub.f32 %v1901_v48, %v1931_v31 }
 0x386   : > { %v1962_v24 = vsel %vm1907_vm4, %v4145_v23, 0.0  ;;  %v1952_v9 = vmul.f32 1.442695, %v1938_v35  ;;  %v2101_v54 = vsel %vm2007_vm3, %v1532_v47, 0 }
 0x387   : > { %1963 = vadd.xlane.f32.xlu1 %v1962_v24  ;;  %v1954_v36 = vmul.f32 1.442695, %v1939_v34 }
 0x388   : > { %v1247_v38 = vpop.permute.xlu0 %1246 }
 0x389   : > { %v4149_v25 = vpop.eup %3308  ;;  %3314 = vpow2.f32 %v1954_v36 }
 0x38a   : > { %v1965_v26 = vsel %vm1907_vm4, %v4149_v25, 0.0  ;;  %3316 = vpow2.f32 %v1952_v9 }
 0x38b   : > { %1966 = vadd.xlane.f32.xlu0 %v1965_v26 }
 0x38d   : > { %v4153_v27 = vpop.eup %3310 }
 0x38e   : > { %v4155_v28 = vpop.eup %3312  ;;  %v1968_v29 = vsel %vm1907_vm4, %v4153_v27, 0.0 }
 0x38f   : > { %v1971_v30 = vsel %vm1907_vm4, %v4155_v28, 0.0  ;;  %1969 = vadd.xlane.f32.xlu0 %v1968_v29 }
 0x390   : > { %1972 = vadd.xlane.f32.xlu1 %v1971_v30 }
 0x396   : > { %v4166_v10 = vpop.eup %3314 }
 0x397   : > { %v4168_v37 = vpop.eup %3316  ;;  %v1977_v11 = vsel %vm1907_vm4, %v4166_v10, 0.0 }
 0x398   : > { %v1974_v12 = vsel %vm1907_vm4, %v4168_v37, 0.0 }
 0x3a1   : > { %1252 = vrot.lane.b32.xlu1 %v3954_v18, %s3616_s26  ;;  %s3526_s26 = sshll.u32 %s3627_s11, 4  ;;  %s3527_s26 = int_to_ptr.vmem [resolvable:$false] %s3526_s26 }
 0x3a2   : > { %p3529_p11 = scmp.lt.s32.totalorder %s4290_s3, %s3527_s26 }
 0x3a5   : > { %1255 = vrot.lane.b32.xlu0 %v3954_v18, %s3617_s30  ;;  %v1250_v18 = vpop.permute.xlu1 %1249  ;;  %s3528_s30 = scalar_lea.vmem %s3527_s26, 256 }
 0x3a6   : > { %p3530_p0 = scmp.lt.s32.totalorder %s3528_s30, %s3522_s24 }
 0x3a8   : > { %p3531_p4 = por %p3530_p0, %p3529_p11 }
 0x3aa   : > { %p3532_p7 = pnand %p3531_p4, %p3525_p10 }
 0x3c4   : > { %1978 = vadd.xlane.f32.xlu0 %v1977_v11 }
 0x3c5   : > { %1975 = vadd.xlane.f32.xlu1 %v1974_v12 }
 0x408   : > { %v1958_v40 = vpop.xlane.xlu1 %1957 }
 0x409   : > { %3318 = vrcp.f32 %v1958_v40  ;;  %v1961_v41 = vpop.xlane.xlu0 %1960 }
 0x40a   : > { %3320 = vrcp.f32 %v1961_v41 }
 0x410   : > { %v1964_v42 = vpop.xlane.xlu1 %1963 }
 0x411   : > { %3322 = vrcp.f32 %v1964_v42 }
 0x414   : > { %v1967_v43 = vpop.xlane.xlu0 %1966 }
 0x415   : > { %3324 = vrcp.f32 %v1967_v43 }
 0x416   : > { %v3319_v44 = vpop.eup %3318 }
 0x417   : > { %v3321_v45 = vpop.eup %3320  ;;  %v1988_v46 = vmul.f32 %v3319_v44, %v3303_v13 }
 0x418   : > { %v1970_v48 = vpop.xlane.xlu0 %1969  ;;  %v1989_v49 = vmul.f32 %v3321_v45, %v3305_v15 }
 0x419   : > { %v1973_v51 = vpop.xlane.xlu1 %1972  ;;  %v1996_v52 = vpack.c.bf16 %v1988_v46, %v1988_v46  ;;  %3326 = vrcp.f32 %v1970_v48 }
 0x41a   : > { %v1997_v53 = vpack.c.bf16 %v1989_v49, %v1989_v49  ;;  %3328 = vrcp.f32 %v1973_v51 }
 0x41b   : > { %3124 = vmatmul.mubr.msk.bf16.vlgmr.msra.gmra.mxu1 %vm1907_vm4, %v1996_v52 }
 0x41c   : > { %3130 = vmatmul.mubr.msk.bf16.vlgmr.msra.gmra.mxu0 %vm1907_vm4, %v1997_v53  ;;  %3134 = vmatpush3.bf16.msra.mxu1 %v2101_v54  ;;  %v1256_v56 = vpop.permute.xlu0 %1255 }
 0x41d   : > { %3140 = vmatpush3.bf16.msra.mxu0 %v2147_v55  ;;  %v1253_v16 = vpop.permute.xlu1 %1252  ;;  %v1306_v57 = vcombine.low %v1250_v18, %v1256_v56  ;;  %v1307_v59 = vcombine.high %v1250_v18, %v1256_v56  ;;  %3135 = vmatprep.mubr.msk.bf16.mxu1 %vm3610_vm0, %v3609_v0 }
 0x41e   : > { %v3323_v17 = vpop.eup %3322  ;;  %v1290_v60 = vcombine.low %v1247_v38, %v1253_v16  ;;  %v1291_v61 = vcombine.high %v1247_v38, %v1253_v16  ;;  %3141 = vmatprep.mubr.msk.bf16.mxu0 %vm3610_vm0, %v3609_v0  ;;  %3145 = vmatprep.subr.bf16.mxu1 %v3609_v0 }
 0x41f   : > { %v1314_v58 = vrot.slane %v1306_v57, %v3960_v32  ;;  %v1321_v62 = vrot.slane %v1307_v59, %v3960_v32  ;;  %v1990_v63 = vmul.f32 %v3323_v17, %v4145_v23  ;;  %3151 = vmatprep.subr.bf16.mxu0 %v3609_v0 }
 0x420   : > { %v1298_v1 = vrot.slane %v1290_v60, %v3960_v32  ;;  %v1305_v2 = vrot.slane %v1291_v61, %v3960_v32 }
 0x421   : > { %v1998_v3 = vpack.c.bf16 %v1990_v63, %v1990_v63 }
 0x422   : > { %v3325_v4 = vpop.eup %3324  ;;  %v1354_v5 = vcombine.low %v1298_v1, %v1314_v58  ;;  %v1355_v6 = vcombine.high %v1298_v1, %v1314_v58  ;;  %v1370_v7 = vcombine.low %v1305_v2, %v1321_v62  ;;  %v1371_v8 = vcombine.high %v1305_v2, %v1321_v62 }
 0x423   : > { %3136 = vmatmul.mubr.msk.bf16.vlgmr.msra.gmra.mxu1 %vm1907_vm4, %v1998_v3  ;;  %v1991_v13 = vmul.f32 %v3325_v4, %v4149_v25 }
 0x424   : > { %v1362_v14 = vrot.slane %v1354_v5, %v3962_v39  ;;  %v1369_v15 = vrot.slane %v1355_v6, %v3962_v39  ;;  %v1378_v19 = vrot.slane %v1370_v7, %v3962_v39  ;;  %v1385_v20 = vrot.slane %v1371_v8, %v3962_v39  ;;  %3147 = vmatprep.mubr.msk.bf16.mxu1 %vm3610_vm0, %v3609_v0 }
 0x425   : > { %v1999_v21 = vpack.c.bf16 %v1991_v13, %v1991_v13 }
 0x426   : > { %v2966_v22 = vcombine.low %v1362_v14, %v1369_v15  ;;  %v2968_v23 = vcombine.high %v1362_v14, %v1369_v15  ;;  %v2970_v24 = vcombine.low %v1378_v19, %v1385_v20  ;;  %v2972_v26 = vcombine.high %v1378_v19, %v1385_v20  ;;  %v3327_v9 = vpop.eup %3326 }
 0x427   : > { %3142 = vmatmul.mubr.msk.bf16.vlgmr.msra.gmra.mxu0 %vm1907_vm4, %v1999_v21  ;;  %v3329_v40 = vpop.eup %3328  ;;  %v1992_v47 = vmul.f32 %v3327_v9, %v4153_v27 }
 0x428   : > { %v1409_v25 = vrot.slane %v2966_v22, %v3960_v32  ;;  %v1425_v29 = vrot.slane %v2968_v23, %v3960_v32  ;;  %v1441_v30 = vrot.slane %v2970_v24, %v3960_v32  ;;  %v1457_v31 = vrot.slane %v2972_v26, %v3960_v32  ;;  %3153 = vmatprep.mubr.msk.bf16.mxu0 %vm3610_vm0, %v3609_v0 }
 0x429   : > { %v1993_v48 = vmul.f32 %v3329_v40, %v4155_v28  ;;  %v2000_v53 = vpack.c.bf16 %v1992_v47, %v1992_v47 }
 0x42a   : > { %v1474_v33 = vcombine.low %v1409_v25, %v1425_v29  ;;  %v1506_v34 = vcombine.low %v1441_v30, %v1457_v31  ;;  %v1475_v35 = vcombine.high %v1409_v25, %v1425_v29  ;;  %v1507_v36 = vcombine.high %v1441_v30, %v1457_v31 }
 0x42b   : > { %v2001_v54 = vpack.c.bf16 %v1993_v48, %v1993_v48 }
 0x42c   : > { %v1482_v11 = vrot.slane %v1474_v33, %v3962_v39  ;;  %v1514_v12 = vrot.slane %v1506_v34, %v3962_v39  ;;  %v1489_v18 = vrot.slane %v1475_v35, %v3962_v39  ;;  %v1521_v38 = vrot.slane %v1507_v36, %v3962_v39 }
 0x42e   : > { %v1526_v41 = vcombine.low %v1482_v11, %v1514_v12  ;;  %v1527_v42 = vcombine.high %v1482_v11, %v1514_v12  ;;  %v1528_v43 = vcombine.low %v1489_v18, %v1521_v38  ;;  %v1529_v44 = vcombine.high %v1489_v18, %v1521_v38 }
 0x430   : > { %v1534_v45 = vpack.c.bf16 %v1526_v41, %v1526_v41  ;;  %v1535_v46 = vpack.c.bf16 %v1527_v42, %v1527_v42  ;;  %v1536_v51 = vpack.c.bf16 %v1528_v43, %v1528_v43  ;;  %v1537_v52 = vpack.c.bf16 %v1529_v44, %v1529_v44 }
 0x432   : > { %v2193_v49 = vsel %vm2007_vm3, %v1534_v45, 0  ;;  %v2239_v50 = vsel %vm2007_vm3, %v1535_v46, 0  ;;  %v2285_v27 = vsel %vm2007_vm3, %v1536_v51, 0  ;;  %v2331_v28 = vsel %vm2007_vm3, %v1537_v52, 0 }
 0x433   : > { %3146 = vmatpush3.bf16.msra.mxu1 %v2193_v49  ;;  %3152 = vmatpush3.bf16.msra.mxu0 %v2239_v50 }
 0x434   : > { %3157 = vmatprep.subr.bf16.mxu1 %v3609_v0  ;;  %3163 = vmatprep.subr.bf16.mxu0 %v3609_v0 }
 0x436   : > { %3148 = vmatmul.mubr.msk.bf16.vlgmr.msra.gmra.mxu1 %vm1907_vm4, %v2000_v53  ;;  %3154 = vmatmul.mubr.msk.bf16.vlgmr.msra.gmra.mxu0 %vm1907_vm4, %v2001_v54 }
 0x437   : > { %3158 = vmatpush3.bf16.msra.mxu1 %v2285_v27  ;;  %3164 = vmatpush3.bf16.msra.mxu0 %v2331_v28 }
 0x438   : > { %3159 = vmatprep.mubr.msk.bf16.mxu1 %vm3610_vm0, %v3609_v0  ;;  %3165 = vmatprep.mubr.msk.bf16.mxu0 %vm3610_vm0, %v3609_v0 }
 0x439   : > { %3169 = vmatprep.subr.bf16.mxu1 %v3609_v0 }
 0x44d   : > { %v1979_v55 = vpop.xlane.xlu0 %1978 }
 0x44e   : > { %v1976_v56 = vpop.xlane.xlu1 %1975  ;;  %3330 = vrcp.f32 %v1979_v55 }
 0x44f   : > { %3332 = vrcp.f32 %v1976_v56 }
 0x45b   : > { %v3331_v16 = vpop.eup %3330 }
 0x45c   : > { %v3333_v57 = vpop.eup %3332  ;;  %v1995_v59 = vmul.f32 %v3331_v16, %v4166_v10 }
 0x45d   : > { %v1994_v17 = vmul.f32 %v3333_v57, %v4168_v37 }
 0x45e   : > { %v2003_v60 = vpack.c.bf16 %v1995_v59, %v1995_v59 }
 0x45f   : > { %v2002_v61 = vpack.c.bf16 %v1994_v17, %v1994_v17 }
 0x460   : > { %3166 = vmatmul.mubr.msk.bf16.vlgmr.msra.gmra.mxu0 %vm1907_vm4, %v2003_v60 }
 0x461   : > { %3160 = vmatmul.mubr.msk.bf16.vlgmr.msra.gmra.mxu1 %vm1907_vm4, %v2002_v61 }
 0x462   : > { %3173 = vmatprep.mubr.msk.bf16.mxu1 %vm3610_vm0, %v3609_v0 }
 0x4db   : > { %v2045_v58 = vpop.f32.mrf.mxu1 }
 0x4dc   : > { %v2091_v62 = vpop.f32.mrf.mxu0 }
 0x4dd   : > { %v3125_v63 = vpop.f32.mrf.mxu1 }
 0x4de   : > { %v3131_v1 = vpop.f32.mrf.mxu0 }
 0x4df   : > { %v2048_v2 = vpop.f32.mrf.mxu1 }
 0x4e0   : > { %v2094_v3 = vpop.f32.mrf.mxu0 }
 0x4e1   : > { %v3126_v4 = vpop.f32.mrf.mxu1 }
 0x4e2   : > { %v3132_v5 = vpop.f32.mrf.mxu0 }
 0x4e3   : > { %v2137_v10 = vpop.f32.mrf.mxu1 }
 0x4e4   : > { %v2373_v37 = vcombine.low %v2045_v58, %v2137_v10  ;;  %v2374_v7 = vcombine.high %v2045_v58, %v2137_v10 }
 0x4e5   : > { %v3137_v6 = vpop.f32.mrf.mxu1 }
 0x4e6   : > { %v2381_v21 = vrot.slane %v2373_v37, %v3960_v32  ;;  %v2388_v22 = vrot.slane %v2374_v7, %v3960_v32 }
 0x4e7   : > { %v2140_v8 = vpop.f32.mrf.mxu1  ;;  %v2183_v13 = vpop.f32.mrf.mxu0 }
 0x4e8   : > { %v2389_v14 = vcombine.low %v2091_v62, %v2183_v13  ;;  %v2390_v15 = vcombine.high %v2091_v62, %v2183_v13 }
 0x4e9   : > { %v3138_v19 = vpop.f32.mrf.mxu1  ;;  %v3143_v20 = vpop.f32.mrf.mxu0 }
 0x4ea   : > { %v2397_v23 = vrot.slane %v2389_v14, %v3960_v32  ;;  %v2404_v24 = vrot.slane %v2390_v15, %v3960_v32 }
 0x4eb   : > { %v2186_v26 = vpop.f32.mrf.mxu0 }
 0x4ec   : > { %v2437_v25 = vcombine.low %v2381_v21, %v2397_v23  ;;  %v2438_v29 = vcombine.high %v2381_v21, %v2397_v23  ;;  %v2453_v30 = vcombine.low %v2388_v22, %v2404_v24  ;;  %v2454_v31 = vcombine.high %v2388_v22, %v2404_v24  ;;  %v3300_v22 = vld [vmem:[#allocation13 + $0x8] sm:$0xff]  }
 0x4ed   : > { %v3144_v33 = vpop.f32.mrf.mxu0  ;;  %3170 = vmatpush3.bf16.msra.mxu1 %v3300_v22 }
 0x4ee   : > { %v2445_v34 = vrot.slane %v2437_v25, %v3962_v39  ;;  %v2452_v35 = vrot.slane %v2438_v29, %v3962_v39  ;;  %v2461_v36 = vrot.slane %v2453_v30, %v3962_v39  ;;  %v2468_v9 = vrot.slane %v2454_v31, %v3962_v39  ;;  %3171 = vmatprep.subr.bf16.mxu1 %v3609_v0 }
 0x4f0   : > { %v2989_v11 = vcombine.low %v2445_v34, %v2452_v35  ;;  %v2991_v12 = vcombine.high %v2445_v34, %v2452_v35  ;;  %v2993_v18 = vcombine.low %v2461_v36, %v2468_v9  ;;  %v2995_v38 = vcombine.high %v2461_v36, %v2468_v9 }
 0x4f2   : > { %v2517_v40 = vrot.slane %v2989_v11, %v3960_v32  ;;  %v2533_v41 = vrot.slane %v2991_v12, %v3960_v32  ;;  %v2549_v42 = vrot.slane %v2993_v18, %v3960_v32  ;;  %v2565_v43 = vrot.slane %v2995_v38, %v3960_v32  ;;  %v3301_v11 = vld [vmem:[#allocation13] sm:$0xff]  }
 0x4f3   : > { %3172 = vmatpush3.bf16.msra.mxu1 %v3301_v11 }
 0x4f4   : > { %v2574_v44 = vcombine.high %v2517_v40, %v2533_v41  ;;  %v2606_v45 = vcombine.high %v2549_v42, %v2565_v43  ;;  %v2573_v46 = vcombine.low %v2517_v40, %v2533_v41  ;;  %v2605_v47 = vcombine.low %v2549_v42, %v2565_v43 }
 0x4f6   : > { %v2229_v48 = vpop.f32.mrf.mxu1  ;;  %v2275_v49 = vpop.f32.mrf.mxu0  ;;  %v2588_v50 = vrot.slane %v2574_v44, %v3962_v39  ;;  %v2620_v51 = vrot.slane %v2606_v45, %v3962_v39  ;;  %v4248_v52 = vrot.slane %v2573_v46, %v3962_v39  ;;  %v4251_v53 = vrot.slane %v2605_v47, %v3962_v39 }
 0x4f8   : > { %v3149_v54 = vpop.f32.mrf.mxu1  ;;  %v3155_v27 = vpop.f32.mrf.mxu0  ;;  %v2639_v28 = vcombine.low %v2588_v50, %v2620_v51  ;;  %v2638_v55 = vcombine.high %v4248_v52, %v4251_v53  ;;  %v2637_v56 = vcombine.low %v4248_v52, %v4251_v53  ;;  %v2640_v60 = vcombine.high %v2588_v50, %v2620_v51 }
 0x4fa   : > { %v2232_v16 = vpop.f32.mrf.mxu1  ;;  %v2278_v57 = vpop.f32.mrf.mxu0  ;;  %2650 = vrot.lane.b32.xlu1 %v2639_v28, %s3620_s15  ;;  %2646 = vrot.lane.b32.xlu0 %v2638_v55, %s3621_s17 }
 0x4fc   : > { %v3150_v59 = vpop.f32.mrf.mxu1  ;;  %v3156_v17 = vpop.f32.mrf.mxu0 }
 0x4fd   : > { %v2997_v59 = vld [vmem:[%s4338_s7] ss:$0 sm:$0xff] }
 0x4fe   : > { %2654 = vrot.lane.b32.xlu1 %v2640_v60, %s3622_s20 }
 0x520   : > { %v2367_v61 = vpop.f32.mrf.mxu0 }
 0x521   : > { %v2321_v58 = vpop.f32.mrf.mxu1  ;;  %v2421_v62 = vcombine.low %v2275_v49, %v2367_v61  ;;  %v2422_v63 = vcombine.high %v2275_v49, %v2367_v61 }
 0x522   : > { %v2405_v1 = vcombine.low %v2229_v48, %v2321_v58  ;;  %v2406_v2 = vcombine.high %v2229_v48, %v2321_v58  ;;  %v3167_v3 = vpop.f32.mrf.mxu0 }
 0x523   : > { %v2429_v4 = vrot.slane %v2421_v62, %v3960_v32  ;;  %v2436_v5 = vrot.slane %v2422_v63, %v3960_v32  ;;  %v3161_v10 = vpop.f32.mrf.mxu1 }
 0x524   : > { %v2413_v6 = vrot.slane %v2405_v1, %v3960_v32  ;;  %v2420_v37 = vrot.slane %v2406_v2, %v3960_v32  ;;  %v2370_v7 = vpop.f32.mrf.mxu0 }
 0x525   : > { %v2324_v8 = vpop.f32.mrf.mxu1 }
 0x526   : > { %v2469_v13 = vcombine.low %v2413_v6, %v2429_v4  ;;  %v2470_v14 = vcombine.high %v2413_v6, %v2429_v4  ;;  %v2485_v15 = vcombine.low %v2420_v37, %v2436_v5  ;;  %v2486_v19 = vcombine.high %v2420_v37, %v2436_v5  ;;  %v3168_v20 = vpop.f32.mrf.mxu0 }
 0x527   : > { %v3162_v21 = vpop.f32.mrf.mxu1 }
 0x528   : > { %v2477_v23 = vrot.slane %v2469_v13, %v3962_v39  ;;  %v2484_v24 = vrot.slane %v2470_v14, %v3962_v39  ;;  %v2493_v26 = vrot.slane %v2485_v15, %v3962_v39  ;;  %v2500_v25 = vrot.slane %v2486_v19, %v3962_v39 }
 0x52a   : > { %v2990_v29 = vcombine.low %v2477_v23, %v2484_v24  ;;  %v2992_v30 = vcombine.high %v2477_v23, %v2484_v24  ;;  %v2994_v31 = vcombine.low %v2493_v26, %v2500_v25  ;;  %v2996_v33 = vcombine.high %v2493_v26, %v2500_v25 }
 0x52c   : > { %v2524_v34 = vrot.slane %v2990_v29, %v3960_v32  ;;  %v2540_v35 = vrot.slane %v2992_v30, %v3960_v32  ;;  %v2556_v36 = vrot.slane %v2994_v31, %v3960_v32  ;;  %v2572_v9 = vrot.slane %v2996_v33, %v3960_v32 }
 0x52e   : > { %v2589_v12 = vcombine.low %v2524_v34, %v2540_v35  ;;  %v2621_v18 = vcombine.low %v2556_v36, %v2572_v9  ;;  %v2590_v38 = vcombine.high %v2524_v34, %v2540_v35  ;;  %v2622_v40 = vcombine.high %v2556_v36, %v2572_v9 }
 0x530   : > { %v2597_v41 = vrot.slane %v2589_v12, %v3962_v39  ;;  %v2629_v42 = vrot.slane %v2621_v18, %v3962_v39  ;;  %v2604_v44 = vrot.slane %v2590_v38, %v3962_v39  ;;  %v2636_v45 = vrot.slane %v2622_v40, %v3962_v39 }
 0x532   : > { %v2642_v43 = vcombine.high %v2597_v41, %v2629_v42  ;;  %v2641_v0 = vcombine.low %v2597_v41, %v2629_v42  ;;  %v2644_v32 = vcombine.high %v2604_v44, %v2636_v45  ;;  %v2643_v46 = vcombine.low %v2604_v44, %v2636_v45 }
 0x534   : > { %2662 = vrot.lane.b32.xlu1 %v2642_v43, %s3623_s21  ;;  %2658 = vrot.lane.b32.xlu0 %v2641_v0, %s3624_s14 }
 0x538   : > { %2670 = vrot.lane.b32.xlu1 %v2644_v32, %s3625_s18  ;;  %2666 = vrot.lane.b32.xlu0 %v2643_v46, %s3626_s25 }
 0x56c   : > { %v2651_v47 = vpop.permute.xlu1 %2650  ;;  %v2647_v48 = vpop.permute.xlu0 %2646 }
 0x56d   : > { %v2673_v49 = vsel %vm1538_vm2, %v2637_v56, %v2647_v48 }
 0x56e   : > { %v2674_v39 = vsel %vm1907_vm4, %v2673_v49, %v2651_v47 }
 0x570   : > { %v2655_v50 = vpop.permute.xlu1 %2654 }
 0x571   : > { %v2676_v51 = vsel %vm2675_vm5, %v2674_v39, %v2655_v50 }
 0x5a6   : > { %v2663_v54 = vpop.permute.xlu1 %2662  ;;  %v2659_v27 = vpop.permute.xlu0 %2658 }
 0x5a7   : > { %v2678_v28 = vsel %vm2677_vm6, %v2676_v51, %v2659_v27 }
 0x5a8   : > { %v2680_v16 = vsel %vm2679_vm7, %v2678_v28, %v2663_v54 }
 0x5aa   : > { %v2671_v55 = vpop.permute.xlu1 %2670  ;;  %v2667_v57 = vpop.permute.xlu0 %2666 }
 0x5ab   : > { %v2682_v52 = vsel %vm2681_vm8, %v2680_v16, %v2667_v57 }
 0x5ac   : > { %v2684_v53 = vsel %vm2683_vm9, %v2682_v52, %v2671_v55 }
 0x5ad   : > { %v2685_v56 = vpack.c.bf16 %v2684_v53, %v2684_v53 }
 0x5af   : > { %3174 = vmatmul.mubr.msk.bf16.vlgmr.msra.gmra.mxu1 %vm470_vm1, %v2685_v56 }
 0x66f   : > { %v2746_v17 = vpop.f32.mrf.mxu1 }
 0x670   : > { %v2747_v60 = vadd.f32 %v2997_v59, %v2746_v17 }
 0x671   : > { %v3175_v61 = vpop.f32.mrf.mxu1 }
 0x672   : > { %2752 = vst [vmem:[%s449_s22] sm:$0xff] %v2747_v60 }
 0x673   : > { %v2749_v58 = vpop.f32.mrf.mxu1 }
 0x674   : > { %3535 = shalt.err (!%p3532_p7)
}
 0x675   : > { %s3536_s15 = scalar_lea.hbm %s4288_s19, 128  ;;  %s3540_s20 = scalar_lea.hbm %s4339_s8, 256 }
 0x676   : > { %p3537_p3 = scmp.ne.s32.totalorder %s4288_s19, %s3536_s15  ;;  %p3541_p6 = scmp.lt.s32.totalorder %s4288_s19, %s4339_s8 }
 0x677   : > { %p3542_p9 = scmp.lt.s32.totalorder %s3540_s20, %s3536_s15 }
 0x678   : > { %p3538_p12 = pnand %p3537_p3, %p4390_p1 }
 0x679   : > { %p3543_p2 = por %p3542_p9, %p3541_p6 }
 0x67a   : > { %p3539_p13 = pneg %p3538_p12 }
 0x67c   : > { %p3544_p5 = pnand %p3543_p2, %p3539_p13 }
 0x67e   : > { %3547 = shalt.err (!%p3544_p5)
}
 0x67f   : > { %3199 = dma.vmem_to_hbm [thread:$0]  (%p4390_p1), %s4290_s3, 128, %s4288_s19, %s2754_s9   ;;  %v3176_v62 = vpop.f32.mrf.mxu1 }
 0x680 PF: > { %s4391_s18 = sld [smem:[#allocation23_spill]]  ;;  %s2779_s23 = sand.u32 1, %s3586_s27  }
 0x681   : > { %s4392_s25 = sld [smem:[#allocation20_spill]]  ;;  %s2780_s1 = scalar_lea.sflag [#allocation4], %s2779_s23 }
 0x686   : > { %p4393_p8 = scmp.ne.s32.totalorder %s4391_s18, 0 }
 0x687   : > { %p4394_p10 = scmp.ge.s32.totalorder %s4392_s25, 2 }
 0x689   : > { %p3225_p11 = pnand %p4394_p10, %p4393_p8 }
 0x68b   : > { %p3226_p0 = pneg %p3225_p11 }
 0x68d   : > { %3581 = dma.done.wait (%p3226_p0), %s2780_s1, 128  }
 0x68e   : > { %3583 = vsyncadd (%p3226_p0), %s2780_s1, 4294967168  ;;  %s4395_s30 = sld [smem:[#allocation21_spill]]  ;;  %s4397_s27 = smov %s3590_s28 }
 0x68f   : > { %s4396_s16 = sld [smem:[#allocation22_spill]]  ;;  %s4398_s28 = smov %s3594_s29 }
 0x694   : > { %p26_p4 = scmp.ge.s32.totalorder %s4395_s30, 4  }
 0x695   : > { %s4399_s29 = smov %s4396_s16 }
 0x696   :  { %28 = sbr.rel (!%p26_p4) target bundleno = 14 (0xe), region = 137 }
 0x69b   :  { %2785 = vsyncpa [#allocation3], 1 }
 0x69c   :  { %2787 = vsyncpa [#allocation3 + $0x1], 1 }
 0x69d   :  { %2788 = vsyncpa [#allocation6], 1 }
 0x69e   :  { %2790 = vsyncpa [#allocation6 + $0x1], 1 }
 0x69f   :  { %2791 = vsyncpa [#allocation9], 1 }
 0x6a0   :  { %2792 = vsyncpa [#allocation12], 1 }
 0x6a1   :  { %2793 = vsyncpa [#allocation4], 1 }
 0x6a2   :  { %2795 = vsyncpa [#allocation4 + $0x1], 1 }

</bundles_post_ra>
